<compile_context>
chip_gen: v6e
topology: v6e:2x2x1
jax: 0.10.0
libtpu: 0.0.40
codegen_flags: <defaults>
</compile_context>

<pallas_src>
import math

import jax
import jax.numpy as jnp
from jax.experimental import pallas as pl
from jax.experimental.pallas import tpu as pltpu

# bf16 MXU inputs (f32 accumulation) is the right default on v5e/v6e/v7x.
# An f32 path is kept for exact verification (see __main__).
MXU_DTYPE = jnp.bfloat16

_SUBLANE = 8
_LANE = 128
_LANE_TARGET = 512   # lanes packed per grid step (review: 512-1024 amortizes step overhead)


def _round_up(a, b):
    return (a + b - 1) // b * b


def num_residual_blocks(n_time_samples, kernel_size):
    inbetween = (n_time_samples - 2 + kernel_size) / (kernel_size - 1)
    return int(math.ceil(math.log2(inbetween)))


# ----------------------------------------------------------------------------
# Pallas kernel
# ----------------------------------------------------------------------------
def make_tcn_kernel(n_blocks, k, T, NB, LP, Cp, mxu_dtype):
    # Static causal shifts per block; dead taps (shift >= T) dropped at build time.
    live_shifts, dead_cols = [], []
    for blk in range(n_blocks):
        all_s = [(k - 1 - j) * (2 ** blk) for j in range(k)]
        live = [s for s in all_s if s < T]        # dead taps are the leading (largest) shifts
        live_shifts.append(live)
        dead_cols.append((k - len(live)) * Cp)

    def kernel(x_ref, w1_ref, b1_ref, w2_ref, b2_ref, wd_ref, bd_ref,
               gam_ref, bet_ref, m_ref, mt_ref, wlb_ref, blp_ref, o_ref):
        # Lane bookkeeping computed in-kernel (scalar/VPU slack) instead of DMA'd inputs.
        lane = jax.lax.broadcasted_iota(jnp.int32, (1, LP), 1)
        t_idx = jnp.where(lane < NB * T, lane % T, -1)    # -1 on pad lanes

        def causal_shift(h, s):
            """Shift right by s inside each length-T segment, zero-filled (causal)."""
            if s == 0:
                return h
            rolled = pltpu.roll(h, shift=s, axis=1)       # XLU lane rotate (idle slot)
            return jnp.where(t_idx >= s, rolled, 0.0)     # re-zero wrapped-around lanes

        x = x_ref[0].astype(jnp.float32)                  # (Cp, LP)

        # ---- TCN residual blocks (statically unrolled; n_blocks is small) ----
        # NOTE: at tiny C/H (Cp=Hp=8) the MXU rows are mostly idle and the kernel is
        # VPU/XLU-bound; the matmul layout pays off at realistic channel counts.
        for blk in range(n_blocks):
            live, cut = live_shifts[blk], dead_cols[blk]
            h = x
            for w_ref, b_ref in ((w1_ref, b1_ref), (w2_ref, b2_ref)):
                # Live causally shifted copies stacked on sublanes -> one fused matmul.
                # TODO(synk): on v5e (single vector-store slot) measure k accumulating
                # dots vs this sublane concat.
                xs = jnp.concatenate([causal_shift(h, s) for s in live], axis=0)
                w = w_ref[blk]
                if cut:
                    w = w[:, cut:]                         # drop dead-tap weight columns
                acc = jnp.dot(w, xs.astype(mxu_dtype),
                              preferred_element_type=jnp.float32)
                h = jnp.maximum(acc + b_ref[blk], 0.0)     # conv -> ReLU (dropout = id)
            x = jnp.maximum(x + h, 0.0)                    # residual add -> ReLU

        # ---- downsample: 1x1 conv -> InstanceNorm1d(affine) -> ReLU -> Linear(T,T) ----
        y = jnp.dot(wd_ref[...], x.astype(mxu_dtype),
                    preferred_element_type=jnp.float32) + bd_ref[...]      # (Hp, LP)

        # InstanceNorm via indicator-matrix matmuls (per-segment sums on the idle MXU;
        # stats kept in f32 so bf16-MXU mode does not perturb the normalization).
        inv_t = 1.0 / T
        m = m_ref[...]                                     # (LP, NBS) 0/1 indicator, f32
        mt = mt_ref[...]                                   # (NBS, LP)
        mean = jnp.dot(y, m, preferred_element_type=jnp.float32) * inv_t   # (Hp, NBS)
        mean_l = jnp.dot(mean, mt, preferred_element_type=jnp.float32)     # (Hp, LP)
        cen = y - mean_l
        var = jnp.dot(cen * cen, m, preferred_element_type=jnp.float32) * inv_t
        inv_l = jnp.dot(jax.lax.rsqrt(var + 1e-5), mt,
                        preferred_element_type=jnp.float32)                # 0 on pad lanes
        y = jnp.maximum(cen * inv_l * gam_ref[...] + bet_ref[...], 0.0)

        # Linear(T, T) per segment == one lane-dense matmul against the block-diagonal
        # (LP, LP) weight; its pad rows/cols are zero so pad-lane garbage cannot leak.
        out = jnp.dot(y.astype(mxu_dtype), wlb_ref[...],
                      preferred_element_type=jnp.float32) + blp_ref[...]
        # TODO(synk): nn.Dropout layers are identity here (inference semantics).
        o_ref[0] = out.astype(o_ref.dtype)                 # single lane-dense (Hp, LP) store

    return kernel


# ----------------------------------------------------------------------------
# Wrapper (layout plumbing only)
# ----------------------------------------------------------------------------
def tcn_encoder_forward(x, params, n_blocks, k, *, mxu_dtype=MXU_DTYPE,
                        lane_target=_LANE_TARGET):
    """x: (N, C, T) float32; params in PyTorch layouts (see __main__).  -> (N, H, T)."""
    N, C, T = x.shape
    w1, b1, w2, b2, wd, bd, gamma, beta, wl, bl = params
    H = wd.shape[0]

    Cp = _round_up(C, _SUBLANE)
    Hp = _round_up(H, _SUBLANE)

    # Pack as many batch elements per grid step as the lane target allows.
    NB = min(N, max(1, lane_target // T))
    while N % NB:
        NB -= 1
    # Keep >= 2 grid steps when possible so both v7x TensorCores get work.
    if N >= 2:
        while NB > 1 and N // NB < 2:
            NB -= 1
            while N % NB:
                NB -= 1
    G = N // NB
    LP = _round_up(NB * T, _LANE)

    # activations: (N, C, T) -> (G, Cp, LP), lane index = local_batch*T + t
    xp = jnp.pad(x, ((0, 0), (0, Cp - C), (0, 0)))
    xp = xp.reshape(G, NB, Cp, T).transpose(0, 2, 1, 3).reshape(G, Cp, NB * T)
    xp = jnp.pad(xp, ((0, 0), (0, 0), (0, LP - NB * T)))

    # fuse the k taps: (n_blocks, C, C, k) -> (n_blocks, Cp, k*Cp), pre-cast for the MXU
    def fuse_w(w):
        wp = jnp.pad(w, ((0, 0), (0, Cp - C), (0, Cp - C), (0, 0)))
        return wp.transpose(0, 1, 3, 2).reshape(n_blocks, Cp, k * Cp).astype(mxu_dtype)

    w1f, w2f = fuse_w(w1), fuse_w(w2)
    b1p = jnp.pad(b1, ((0, 0), (0, Cp - C)))[:, :, None]          # (n_blocks, Cp, 1) f32
    b2p = jnp.pad(b2, ((0, 0), (0, Cp - C)))[:, :, None]
    wdp = jnp.pad(wd, ((0, Hp - H), (0, Cp - C))).astype(mxu_dtype)  # (Hp, Cp)
    bdp = jnp.pad(bd, (0, Hp - H))[:, None]                       # (Hp, 1) f32
    gp = jnp.pad(gamma, (0, Hp - H), constant_values=1.0)[:, None]
    bep = jnp.pad(beta, (0, Hp - H))[:, None]

    # block-diagonal Linear(T,T) weight (pre-cast) + tiled bias over the packed lanes
    wlb = jnp.zeros((LP, LP), jnp.float32)
    blp = jnp.zeros((1, LP), jnp.float32)
    for n in range(NB):
        wlb = wlb.at[n * T:(n + 1) * T, n * T:(n + 1) * T].set(wl.T)
        blp = blp.at[0, n * T:(n + 1) * T].set(bl)
    wlb = wlb.astype(mxu_dtype)

    # per-segment 0/1 indicator matrices for the InstanceNorm matmuls (f32: exact stats)
    NBS = _round_up(NB, _SUBLANE)
    lane = jnp.arange(LP, dtype=jnp.int32)
    seg = jnp.where(lane < NB * T, lane // T, -1)
    Mf = (seg[:, None] == jnp.arange(NBS, dtype=jnp.int32)[None, :]).astype(jnp.float32)
    MTf = Mf.T

    consts = (w1f, b1p, w2f, b2p, wdp, bdp, gp, bep, Mf, MTf, wlb, blp)

    def const_spec(a):
        nd = a.ndim
        # grid-invariant operands: single buffer (no pointless double-buffering)
        return pl.BlockSpec(a.shape, lambda g, _nd=nd: (0,) * _nd,
                            pipeline_mode=pl.Buffered(1))

    # VMEM budget from the actual resident buffers (v7x note: keep under ~48 MiB of 64 MiB)
    const_bytes = sum(int(a.size) * a.dtype.itemsize for a in consts)
    io_bytes = 2 * (Cp * LP + Hp * LP) * 4                       # double-buffered x / out
    tmp_bytes = (6 * k * Cp + 8 * Hp) * LP * 4                   # in-kernel temporaries (est.)
    vmem_limit = min(max(int(1.5 * (const_bytes + io_bytes + tmp_bytes)), 32 << 20), 96 << 20)

    kernel = make_tcn_kernel(n_blocks, k, T, NB, LP, Cp, mxu_dtype)
    out_packed = pl.pallas_call(
        kernel,
        out_shape=jax.ShapeDtypeStruct((G, Hp, LP), x.dtype),
        grid=(G,),
        in_specs=[pl.BlockSpec((1, Cp, LP), lambda g: (g, 0, 0))]
                + [const_spec(a) for a in consts],
        out_specs=pl.BlockSpec((1, Hp, LP), lambda g: (g, 0, 0)),
        compiler_params=pltpu.CompilerParams(
            dimension_semantics=("parallel",),      # batch tiles across TCs on v7x
            vmem_limit_bytes=vmem_limit,
        ),
    )(xp, *consts)

    # unpack: (G, Hp, LP) -> (N, H, T)
    out = out_packed[:, :H, :NB * T].reshape(G, H, NB, T)
    return out.transpose(0, 2, 1, 3).reshape(N, H, T)


# ----------------------------------------------------------------------------
# Pure-JAX reference (ground truth) for verification
# ----------------------------------------------------------------------------
def reference_forward(x, params, n_blocks, k):
    w1, b1, w2, b2, wd, bd, gamma, beta, wl, bl = params
    _, C, T = x.shape

    def conv(h, w, b, d):
        pad = (k - 1) * d
        hp = jnp.pad(h, ((0, 0), (pad, 0)))       # causal left pad
        out = jnp.zeros((w.shape[0], T), jnp.float32)
        for j in range(k):
            out = out + w[:, :, j] @ hp[:, j * d: j * d + T]
        return out + b[:, None]

    def one(xb):
        h0 = xb
        for blk in range(n_blocks):
            d = 2 ** blk
            h = jnp.maximum(conv(h0, w1[blk], b1[blk], d), 0.0)
            h = jnp.maximum(conv(h, w2[blk], b2[blk], d), 0.0)
            h0 = jnp.maximum(h0 + h, 0.0)
        y = wd @ h0 + bd[:, None]
        mean = jnp.mean(y, axis=1, keepdims=True)
        var = jnp.mean((y - mean) ** 2, axis=1, keepdims=True)
        y = (y - mean) / jnp.sqrt(var + 1e-5)
        y = y * gamma[:, None] + beta[:, None]
        y = jnp.maximum(y, 0.0)
        return y @ wl.T + bl

    return jax.vmap(one)(x)


# ----------------------------------------------------------------------------
# Main
# ----------------------------------------------------------------------------
if __name__ == "__main__":
    # x is (batch, n_channels, n_time_samples), hidden_size = 2 (module default).
    N, C, T = 2, 4, 16
    k = 3
    H = 2

    n_blocks = num_residual_blocks(T, k)   # = 4 -> dilations 1, 2, 4, 8

    key = jax.random.PRNGKey(0)
    keys = jax.random.split(key, 12)

    x = jax.random.normal(keys[0], (N, C, T), jnp.float32)

    # Deterministic synthetic parameters in PyTorch layouts (not a checkpoint).
    w1 = 0.3 * jax.random.normal(keys[1], (n_blocks, C, C, k), jnp.float32)
    b1 = 0.1 * jax.random.normal(keys[2], (n_blocks, C), jnp.float32)
    w2 = 0.3 * jax.random.normal(keys[3], (n_blocks, C, C, k), jnp.float32)
    b2 = 0.1 * jax.random.normal(keys[4], (n_blocks, C), jnp.float32)
    wd = 0.3 * jax.random.normal(keys[5], (H, C), jnp.float32)       # Conv1d(C->H, k=1)
    bd = 0.1 * jax.random.normal(keys[6], (H,), jnp.float32)
    gamma = 1.0 + 0.1 * jax.random.normal(keys[7], (H,), jnp.float32)  # InstanceNorm affine
    beta = 0.1 * jax.random.normal(keys[8], (H,), jnp.float32)
    wl = 0.3 * jax.random.normal(keys[9], (T, T), jnp.float32)       # Linear(T, T) weight
    bl = 0.1 * jax.random.normal(keys[10], (T,), jnp.float32)        # Linear bias

    params = (w1, b1, w2, b2, wd, bd, gamma, beta, wl, bl)

    ref = reference_forward(x, params, n_blocks, k)

    # Exact check against the reference with f32 MXU inputs (correctness gate).
    out_f32 = jax.block_until_ready(
        tcn_encoder_forward(x, params, n_blocks, k, mxu_dtype=jnp.float32))
    assert out_f32.shape == (N, H, T), out_f32.shape
    err_f32 = float(jnp.max(jnp.abs(out_f32 - ref)))
    assert jnp.allclose(out_f32, ref, atol=1e-3, rtol=1e-3), err_f32

    # Default bf16-MXU path (f32 accumulation) -- relaxed tolerance per review.
    out_bf16 = jax.block_until_ready(tcn_encoder_forward(x, params, n_blocks, k))
    err_bf16 = float(jnp.max(jnp.abs(out_bf16 - ref)))
    assert jnp.allclose(out_bf16, ref, atol=2e-1, rtol=2e-1), err_bf16

    print("KERNEL_OK")
</pallas_src>

<mosaic_0001>
module attributes {stable_mosaic.version = 11 : i64} {
  func.func @kernel(%arg0: i32, %arg1: memref<1x8x128xf32, #tpu.memory_space<vmem>>, %arg2: memref<4x8x24xf32, #tpu.memory_space<vmem>>, %arg3: memref<4x8x1xf32, #tpu.memory_space<vmem>>, %arg4: memref<4x8x24xf32, #tpu.memory_space<vmem>>, %arg5: memref<4x8x1xf32, #tpu.memory_space<vmem>>, %arg6: memref<8x8xf32, #tpu.memory_space<vmem>>, %arg7: memref<8x1xf32, #tpu.memory_space<vmem>>, %arg8: memref<8x1xf32, #tpu.memory_space<vmem>>, %arg9: memref<8x1xf32, #tpu.memory_space<vmem>>, %arg10: memref<128x8xf32, #tpu.memory_space<vmem>>, %arg11: memref<8x128xf32, #tpu.memory_space<vmem>>, %arg12: memref<128x128xf32, #tpu.memory_space<vmem>>, %arg13: memref<1x128xf32, #tpu.memory_space<vmem>>, %arg14: memref<1x8x128xf32, #tpu.memory_space<vmem>>) attributes {dimension_semantics = [#tpu.dimension_semantics<parallel>], iteration_bounds = array<i64: 2>, scalar_prefetch = 0 : i64, scratch_operands = 0 : i64, tpu.core_type = #tpu.core_type<tc>, window_params = [{transform_indices = @transform_0, window_bounds = array<i64: 1, 8, 128>}, {pipeline_mode = #tpu.pipeline_mode<synchronous>, transform_indices = @transform_1, window_bounds = array<i64: 4, 8, 24>}, {pipeline_mode = #tpu.pipeline_mode<synchronous>, transform_indices = @transform_2, window_bounds = array<i64: 4, 8, 1>}, {pipeline_mode = #tpu.pipeline_mode<synchronous>, transform_indices = @transform_3, window_bounds = array<i64: 4, 8, 24>}, {pipeline_mode = #tpu.pipeline_mode<synchronous>, transform_indices = @transform_4, window_bounds = array<i64: 4, 8, 1>}, {pipeline_mode = #tpu.pipeline_mode<synchronous>, transform_indices = @transform_5, window_bounds = array<i64: 8, 8>}, {pipeline_mode = #tpu.pipeline_mode<synchronous>, transform_indices = @transform_6, window_bounds = array<i64: 8, 1>}, {pipeline_mode = #tpu.pipeline_mode<synchronous>, transform_indices = @transform_7, window_bounds = array<i64: 8, 1>}, {pipeline_mode = #tpu.pipeline_mode<synchronous>, transform_indices = @transform_8, window_bounds = array<i64: 8, 1>}, {pipeline_mode = #tpu.pipeline_mode<synchronous>, transform_indices = @transform_9, window_bounds = array<i64: 128, 8>}, {pipeline_mode = #tpu.pipeline_mode<synchronous>, transform_indices = @transform_10, window_bounds = array<i64: 8, 128>}, {pipeline_mode = #tpu.pipeline_mode<synchronous>, transform_indices = @transform_11, window_bounds = array<i64: 128, 128>}, {pipeline_mode = #tpu.pipeline_mode<synchronous>, transform_indices = @transform_12, window_bounds = array<i64: 1, 128>}, {transform_indices = @transform_13, window_bounds = array<i64: 1, 8, 128>}]} {
    %0 = tpu.iota {dimensions = array<i32: 1>} : vector<1x128xi32>
    %c16_i32 = arith.constant 16 : i32
    %1 = vector.broadcast %c16_i32 : i32 to vector<1x128xi32>
    %2 = arith.cmpi slt, %0, %1 : vector<1x128xi32>
    %c16_i32_0 = arith.constant 16 : i32
    %c0_i32 = arith.constant 0 : i32
    %3 = arith.cmpi eq, %c16_i32_0, %c0_i32 : i32
    %c1_i32 = arith.constant 1 : i32
    %4 = arith.select %3, %c1_i32, %c16_i32_0 : i32
    %5 = vector.broadcast %4 : i32 to vector<1x128xi32>
    %6 = arith.remsi %0, %5 : vector<1x128xi32>
    %c0_i32_1 = arith.constant 0 : i32
    %7 = vector.broadcast %c0_i32_1 : i32 to vector<1x128xi32>
    %8 = arith.cmpi ne, %6, %7 : vector<1x128xi32>
    %c0_i32_2 = arith.constant 0 : i32
    %9 = vector.broadcast %c0_i32_2 : i32 to vector<1x128xi32>
    %10 = arith.cmpi slt, %6, %9 : vector<1x128xi32>
    %c0_i32_3 = arith.constant 0 : i32
    %11 = arith.cmpi slt, %4, %c0_i32_3 : i32
    %12 = vector.broadcast %11 : i1 to vector<1x128xi1>
    %13 = vector.broadcast %12 : vector<1x128xi1> to vector<1x128xi1>
    %14 = arith.xori %10, %13 : vector<1x128xi1>
    %15 = arith.andi %14, %8 : vector<1x128xi1>
    %16 = vector.broadcast %4 : i32 to vector<1x128xi32>
    %17 = arith.addi %6, %16 : vector<1x128xi32>
    %18 = arith.select %15, %17, %6 : vector<1x128xi1>, vector<1x128xi32>
    %c-1_i32 = arith.constant -1 : i32
    %19 = vector.broadcast %c-1_i32 : i32 to vector<1x128xi32>
    %20 = arith.select %2, %18, %19 : vector<1x128xi1>, vector<1x128xi32>
    %c0 = arith.constant 0 : index
    %c0_4 = arith.constant 0 : index
    %c0_5 = arith.constant 0 : index
    %21 = vector.load %arg1[%c0, %c0_4, %c0_5] : memref<1x8x128xf32, #tpu.memory_space<vmem>>, vector<1x8x128xf32>
    %22 = vector.shape_cast %21 : vector<1x8x128xf32> to vector<8x128xf32>
    %c2_i32 = arith.constant 2 : i32
    %23 = tpu.dynamic_rotate %22 by %c2_i32 dim 1 : vector<8x128xf32>, i32 -> vector<8x128xf32>
    %c2_i32_6 = arith.constant 2 : i32
    %24 = vector.broadcast %c2_i32_6 : i32 to vector<1x128xi32>
    %25 = arith.cmpi sge, %20, %24 : vector<1x128xi32>
    %cst = arith.constant 0.000000e+00 : f32
    %26 = vector.shape_cast %25 : vector<1x128xi1> to vector<1x128xi1>
    %27 = vector.broadcast %26 : vector<1x128xi1> to vector<8x128xi1>
    %28 = vector.broadcast %cst : f32 to vector<8x128xf32>
    %29 = arith.select %27, %23, %28 : vector<8x128xi1>, vector<8x128xf32>
    %c1_i32_7 = arith.constant 1 : i32
    %30 = tpu.dynamic_rotate %22 by %c1_i32_7 dim 1 : vector<8x128xf32>, i32 -> vector<8x128xf32>
    %c1_i32_8 = arith.constant 1 : i32
    %31 = vector.broadcast %c1_i32_8 : i32 to vector<1x128xi32>
    %32 = arith.cmpi sge, %20, %31 : vector<1x128xi32>
    %cst_9 = arith.constant 0.000000e+00 : f32
    %33 = vector.shape_cast %32 : vector<1x128xi1> to vector<1x128xi1>
    %34 = vector.broadcast %33 : vector<1x128xi1> to vector<8x128xi1>
    %35 = vector.broadcast %cst_9 : f32 to vector<8x128xf32>
    %36 = arith.select %34, %30, %35 : vector<8x128xi1>, vector<8x128xf32>
    %37 = tpu.concatenate %29, %36, %22 in 0 : vector<8x128xf32>, vector<8x128xf32>, vector<8x128xf32> -> vector<24x128xf32>
    %c0_10 = arith.constant 0 : index
    %c0_11 = arith.constant 0 : index
    %c0_12 = arith.constant 0 : index
    %38 = vector.load %arg2[%c0_10, %c0_11, %c0_12] : memref<4x8x24xf32, #tpu.memory_space<vmem>>, vector<1x8x24xf32>
    %39 = vector.shape_cast %38 : vector<1x8x24xf32> to vector<8x24xf32>
    %cst_13 = arith.constant dense<0.000000e+00> : vector<8x128xf32>
    %40 = tpu.matmul %39, %37, %cst_13 {dimension_numbers = #tpu.dot_dimension_numbers<[1], [0], [0], [1], [0, 0, 1, 1], [], []>} : vector<8x24xf32>, vector<24x128xf32>, vector<8x128xf32> -> vector<8x128xf32>
    %c0_14 = arith.constant 0 : index
    %c0_15 = arith.constant 0 : index
    %c0_16 = arith.constant 0 : index
    %41 = vector.load %arg3[%c0_14, %c0_15, %c0_16] : memref<4x8x1xf32, #tpu.memory_space<vmem>>, vector<1x8x1xf32>
    %42 = vector.shape_cast %41 : vector<1x8x1xf32> to vector<8x1xf32>
    %43 = vector.broadcast %42 : vector<8x1xf32> to vector<8x128xf32>
    %44 = arith.addf %40, %43 : vector<8x128xf32>
    %cst_17 = arith.constant 0.000000e+00 : f32
    %45 = vector.broadcast %cst_17 : f32 to vector<8x128xf32>
    %46 = arith.maximumf %44, %45 : vector<8x128xf32>
    %c2_i32_18 = arith.constant 2 : i32
    %47 = tpu.dynamic_rotate %46 by %c2_i32_18 dim 1 : vector<8x128xf32>, i32 -> vector<8x128xf32>
    %c2_i32_19 = arith.constant 2 : i32
    %48 = vector.broadcast %c2_i32_19 : i32 to vector<1x128xi32>
    %49 = arith.cmpi sge, %20, %48 : vector<1x128xi32>
    %cst_20 = arith.constant 0.000000e+00 : f32
    %50 = vector.shape_cast %49 : vector<1x128xi1> to vector<1x128xi1>
    %51 = vector.broadcast %50 : vector<1x128xi1> to vector<8x128xi1>
    %52 = vector.broadcast %cst_20 : f32 to vector<8x128xf32>
    %53 = arith.select %51, %47, %52 : vector<8x128xi1>, vector<8x128xf32>
    %c1_i32_21 = arith.constant 1 : i32
    %54 = tpu.dynamic_rotate %46 by %c1_i32_21 dim 1 : vector<8x128xf32>, i32 -> vector<8x128xf32>
    %c1_i32_22 = arith.constant 1 : i32
    %55 = vector.broadcast %c1_i32_22 : i32 to vector<1x128xi32>
    %56 = arith.cmpi sge, %20, %55 : vector<1x128xi32>
    %cst_23 = arith.constant 0.000000e+00 : f32
    %57 = vector.shape_cast %56 : vector<1x128xi1> to vector<1x128xi1>
    %58 = vector.broadcast %57 : vector<1x128xi1> to vector<8x128xi1>
    %59 = vector.broadcast %cst_23 : f32 to vector<8x128xf32>
    %60 = arith.select %58, %54, %59 : vector<8x128xi1>, vector<8x128xf32>
    %61 = tpu.concatenate %53, %60, %46 in 0 : vector<8x128xf32>, vector<8x128xf32>, vector<8x128xf32> -> vector<24x128xf32>
    %c0_24 = arith.constant 0 : index
    %c0_25 = arith.constant 0 : index
    %c0_26 = arith.constant 0 : index
    %62 = vector.load %arg4[%c0_24, %c0_25, %c0_26] : memref<4x8x24xf32, #tpu.memory_space<vmem>>, vector<1x8x24xf32>
    %63 = vector.shape_cast %62 : vector<1x8x24xf32> to vector<8x24xf32>
    %cst_27 = arith.constant dense<0.000000e+00> : vector<8x128xf32>
    %64 = tpu.matmul %63, %61, %cst_27 {dimension_numbers = #tpu.dot_dimension_numbers<[1], [0], [0], [1], [0, 0, 1, 1], [], []>} : vector<8x24xf32>, vector<24x128xf32>, vector<8x128xf32> -> vector<8x128xf32>
    %c0_28 = arith.constant 0 : index
    %c0_29 = arith.constant 0 : index
    %c0_30 = arith.constant 0 : index
    %65 = vector.load %arg5[%c0_28, %c0_29, %c0_30] : memref<4x8x1xf32, #tpu.memory_space<vmem>>, vector<1x8x1xf32>
    %66 = vector.shape_cast %65 : vector<1x8x1xf32> to vector<8x1xf32>
    %67 = vector.broadcast %66 : vector<8x1xf32> to vector<8x128xf32>
    %68 = arith.addf %64, %67 : vector<8x128xf32>
    %cst_31 = arith.constant 0.000000e+00 : f32
    %69 = vector.broadcast %cst_31 : f32 to vector<8x128xf32>
    %70 = arith.maximumf %68, %69 : vector<8x128xf32>
    %71 = arith.addf %22, %70 : vector<8x128xf32>
    %cst_32 = arith.constant 0.000000e+00 : f32
    %72 = vector.broadcast %cst_32 : f32 to vector<8x128xf32>
    %73 = arith.maximumf %71, %72 : vector<8x128xf32>
    %c4_i32 = arith.constant 4 : i32
    %74 = tpu.dynamic_rotate %73 by %c4_i32 dim 1 : vector<8x128xf32>, i32 -> vector<8x128xf32>
    %c4_i32_33 = arith.constant 4 : i32
    %75 = vector.broadcast %c4_i32_33 : i32 to vector<1x128xi32>
    %76 = arith.cmpi sge, %20, %75 : vector<1x128xi32>
    %cst_34 = arith.constant 0.000000e+00 : f32
    %77 = vector.shape_cast %76 : vector<1x128xi1> to vector<1x128xi1>
    %78 = vector.broadcast %77 : vector<1x128xi1> to vector<8x128xi1>
    %79 = vector.broadcast %cst_34 : f32 to vector<8x128xf32>
    %80 = arith.select %78, %74, %79 : vector<8x128xi1>, vector<8x128xf32>
    %c2_i32_35 = arith.constant 2 : i32
    %81 = tpu.dynamic_rotate %73 by %c2_i32_35 dim 1 : vector<8x128xf32>, i32 -> vector<8x128xf32>
    %c2_i32_36 = arith.constant 2 : i32
    %82 = vector.broadcast %c2_i32_36 : i32 to vector<1x128xi32>
    %83 = arith.cmpi sge, %20, %82 : vector<1x128xi32>
    %cst_37 = arith.constant 0.000000e+00 : f32
    %84 = vector.shape_cast %83 : vector<1x128xi1> to vector<1x128xi1>
    %85 = vector.broadcast %84 : vector<1x128xi1> to vector<8x128xi1>
    %86 = vector.broadcast %cst_37 : f32 to vector<8x128xf32>
    %87 = arith.select %85, %81, %86 : vector<8x128xi1>, vector<8x128xf32>
    %88 = tpu.concatenate %80, %87, %73 in 0 : vector<8x128xf32>, vector<8x128xf32>, vector<8x128xf32> -> vector<24x128xf32>
    %c1 = arith.constant 1 : index
    %c0_38 = arith.constant 0 : index
    %c0_39 = arith.constant 0 : index
    %89 = vector.load %arg2[%c1, %c0_38, %c0_39] : memref<4x8x24xf32, #tpu.memory_space<vmem>>, vector<1x8x24xf32>
    %90 = vector.shape_cast %89 : vector<1x8x24xf32> to vector<8x24xf32>
    %cst_40 = arith.constant dense<0.000000e+00> : vector<8x128xf32>
    %91 = tpu.matmul %90, %88, %cst_40 {dimension_numbers = #tpu.dot_dimension_numbers<[1], [0], [0], [1], [0, 0, 1, 1], [], []>} : vector<8x24xf32>, vector<24x128xf32>, vector<8x128xf32> -> vector<8x128xf32>
    %c1_41 = arith.constant 1 : index
    %c0_42 = arith.constant 0 : index
    %c0_43 = arith.constant 0 : index
    %92 = vector.load %arg3[%c1_41, %c0_42, %c0_43] : memref<4x8x1xf32, #tpu.memory_space<vmem>>, vector<1x8x1xf32>
    %93 = vector.shape_cast %92 : vector<1x8x1xf32> to vector<8x1xf32>
    %94 = vector.broadcast %93 : vector<8x1xf32> to vector<8x128xf32>
    %95 = arith.addf %91, %94 : vector<8x128xf32>
    %cst_44 = arith.constant 0.000000e+00 : f32
    %96 = vector.broadcast %cst_44 : f32 to vector<8x128xf32>
    %97 = arith.maximumf %95, %96 : vector<8x128xf32>
    %c4_i32_45 = arith.constant 4 : i32
    %98 = tpu.dynamic_rotate %97 by %c4_i32_45 dim 1 : vector<8x128xf32>, i32 -> vector<8x128xf32>
    %c4_i32_46 = arith.constant 4 : i32
    %99 = vector.broadcast %c4_i32_46 : i32 to vector<1x128xi32>
    %100 = arith.cmpi sge, %20, %99 : vector<1x128xi32>
    %cst_47 = arith.constant 0.000000e+00 : f32
    %101 = vector.shape_cast %100 : vector<1x128xi1> to vector<1x128xi1>
    %102 = vector.broadcast %101 : vector<1x128xi1> to vector<8x128xi1>
    %103 = vector.broadcast %cst_47 : f32 to vector<8x128xf32>
    %104 = arith.select %102, %98, %103 : vector<8x128xi1>, vector<8x128xf32>
    %c2_i32_48 = arith.constant 2 : i32
    %105 = tpu.dynamic_rotate %97 by %c2_i32_48 dim 1 : vector<8x128xf32>, i32 -> vector<8x128xf32>
    %c2_i32_49 = arith.constant 2 : i32
    %106 = vector.broadcast %c2_i32_49 : i32 to vector<1x128xi32>
    %107 = arith.cmpi sge, %20, %106 : vector<1x128xi32>
    %cst_50 = arith.constant 0.000000e+00 : f32
    %108 = vector.shape_cast %107 : vector<1x128xi1> to vector<1x128xi1>
    %109 = vector.broadcast %108 : vector<1x128xi1> to vector<8x128xi1>
    %110 = vector.broadcast %cst_50 : f32 to vector<8x128xf32>
    %111 = arith.select %109, %105, %110 : vector<8x128xi1>, vector<8x128xf32>
    %112 = tpu.concatenate %104, %111, %97 in 0 : vector<8x128xf32>, vector<8x128xf32>, vector<8x128xf32> -> vector<24x128xf32>
    %c1_51 = arith.constant 1 : index
    %c0_52 = arith.constant 0 : index
    %c0_53 = arith.constant 0 : index
    %113 = vector.load %arg4[%c1_51, %c0_52, %c0_53] : memref<4x8x24xf32, #tpu.memory_space<vmem>>, vector<1x8x24xf32>
    %114 = vector.shape_cast %113 : vector<1x8x24xf32> to vector<8x24xf32>
    %cst_54 = arith.constant dense<0.000000e+00> : vector<8x128xf32>
    %115 = tpu.matmul %114, %112, %cst_54 {dimension_numbers = #tpu.dot_dimension_numbers<[1], [0], [0], [1], [0, 0, 1, 1], [], []>} : vector<8x24xf32>, vector<24x128xf32>, vector<8x128xf32> -> vector<8x128xf32>
    %c1_55 = arith.constant 1 : index
    %c0_56 = arith.constant 0 : index
    %c0_57 = arith.constant 0 : index
    %116 = vector.load %arg5[%c1_55, %c0_56, %c0_57] : memref<4x8x1xf32, #tpu.memory_space<vmem>>, vector<1x8x1xf32>
    %117 = vector.shape_cast %116 : vector<1x8x1xf32> to vector<8x1xf32>
    %118 = vector.broadcast %117 : vector<8x1xf32> to vector<8x128xf32>
    %119 = arith.addf %115, %118 : vector<8x128xf32>
    %cst_58 = arith.constant 0.000000e+00 : f32
    %120 = vector.broadcast %cst_58 : f32 to vector<8x128xf32>
    %121 = arith.maximumf %119, %120 : vector<8x128xf32>
    %122 = arith.addf %73, %121 : vector<8x128xf32>
    %cst_59 = arith.constant 0.000000e+00 : f32
    %123 = vector.broadcast %cst_59 : f32 to vector<8x128xf32>
    %124 = arith.maximumf %122, %123 : vector<8x128xf32>
    %c8_i32 = arith.constant 8 : i32
    %125 = tpu.dynamic_rotate %124 by %c8_i32 dim 1 : vector<8x128xf32>, i32 -> vector<8x128xf32>
    %c8_i32_60 = arith.constant 8 : i32
    %126 = vector.broadcast %c8_i32_60 : i32 to vector<1x128xi32>
    %127 = arith.cmpi sge, %20, %126 : vector<1x128xi32>
    %cst_61 = arith.constant 0.000000e+00 : f32
    %128 = vector.shape_cast %127 : vector<1x128xi1> to vector<1x128xi1>
    %129 = vector.broadcast %128 : vector<1x128xi1> to vector<8x128xi1>
    %130 = vector.broadcast %cst_61 : f32 to vector<8x128xf32>
    %131 = arith.select %129, %125, %130 : vector<8x128xi1>, vector<8x128xf32>
    %c4_i32_62 = arith.constant 4 : i32
    %132 = tpu.dynamic_rotate %124 by %c4_i32_62 dim 1 : vector<8x128xf32>, i32 -> vector<8x128xf32>
    %c4_i32_63 = arith.constant 4 : i32
    %133 = vector.broadcast %c4_i32_63 : i32 to vector<1x128xi32>
    %134 = arith.cmpi sge, %20, %133 : vector<1x128xi32>
    %cst_64 = arith.constant 0.000000e+00 : f32
    %135 = vector.shape_cast %134 : vector<1x128xi1> to vector<1x128xi1>
    %136 = vector.broadcast %135 : vector<1x128xi1> to vector<8x128xi1>
    %137 = vector.broadcast %cst_64 : f32 to vector<8x128xf32>
    %138 = arith.select %136, %132, %137 : vector<8x128xi1>, vector<8x128xf32>
    %139 = tpu.concatenate %131, %138, %124 in 0 : vector<8x128xf32>, vector<8x128xf32>, vector<8x128xf32> -> vector<24x128xf32>
    %c2 = arith.constant 2 : index
    %c0_65 = arith.constant 0 : index
    %c0_66 = arith.constant 0 : index
    %140 = vector.load %arg2[%c2, %c0_65, %c0_66] : memref<4x8x24xf32, #tpu.memory_space<vmem>>, vector<1x8x24xf32>
    %141 = vector.shape_cast %140 : vector<1x8x24xf32> to vector<8x24xf32>
    %cst_67 = arith.constant dense<0.000000e+00> : vector<8x128xf32>
    %142 = tpu.matmul %141, %139, %cst_67 {dimension_numbers = #tpu.dot_dimension_numbers<[1], [0], [0], [1], [0, 0, 1, 1], [], []>} : vector<8x24xf32>, vector<24x128xf32>, vector<8x128xf32> -> vector<8x128xf32>
    %c2_68 = arith.constant 2 : index
    %c0_69 = arith.constant 0 : index
    %c0_70 = arith.constant 0 : index
    %143 = vector.load %arg3[%c2_68, %c0_69, %c0_70] : memref<4x8x1xf32, #tpu.memory_space<vmem>>, vector<1x8x1xf32>
    %144 = vector.shape_cast %143 : vector<1x8x1xf32> to vector<8x1xf32>
    %145 = vector.broadcast %144 : vector<8x1xf32> to vector<8x128xf32>
    %146 = arith.addf %142, %145 : vector<8x128xf32>
    %cst_71 = arith.constant 0.000000e+00 : f32
    %147 = vector.broadcast %cst_71 : f32 to vector<8x128xf32>
    %148 = arith.maximumf %146, %147 : vector<8x128xf32>
    %c8_i32_72 = arith.constant 8 : i32
    %149 = tpu.dynamic_rotate %148 by %c8_i32_72 dim 1 : vector<8x128xf32>, i32 -> vector<8x128xf32>
    %c8_i32_73 = arith.constant 8 : i32
    %150 = vector.broadcast %c8_i32_73 : i32 to vector<1x128xi32>
    %151 = arith.cmpi sge, %20, %150 : vector<1x128xi32>
    %cst_74 = arith.constant 0.000000e+00 : f32
    %152 = vector.shape_cast %151 : vector<1x128xi1> to vector<1x128xi1>
    %153 = vector.broadcast %152 : vector<1x128xi1> to vector<8x128xi1>
    %154 = vector.broadcast %cst_74 : f32 to vector<8x128xf32>
    %155 = arith.select %153, %149, %154 : vector<8x128xi1>, vector<8x128xf32>
    %c4_i32_75 = arith.constant 4 : i32
    %156 = tpu.dynamic_rotate %148 by %c4_i32_75 dim 1 : vector<8x128xf32>, i32 -> vector<8x128xf32>
    %c4_i32_76 = arith.constant 4 : i32
    %157 = vector.broadcast %c4_i32_76 : i32 to vector<1x128xi32>
    %158 = arith.cmpi sge, %20, %157 : vector<1x128xi32>
    %cst_77 = arith.constant 0.000000e+00 : f32
    %159 = vector.shape_cast %158 : vector<1x128xi1> to vector<1x128xi1>
    %160 = vector.broadcast %159 : vector<1x128xi1> to vector<8x128xi1>
    %161 = vector.broadcast %cst_77 : f32 to vector<8x128xf32>
    %162 = arith.select %160, %156, %161 : vector<8x128xi1>, vector<8x128xf32>
    %163 = tpu.concatenate %155, %162, %148 in 0 : vector<8x128xf32>, vector<8x128xf32>, vector<8x128xf32> -> vector<24x128xf32>
    %c2_78 = arith.constant 2 : index
    %c0_79 = arith.constant 0 : index
    %c0_80 = arith.constant 0 : index
    %164 = vector.load %arg4[%c2_78, %c0_79, %c0_80] : memref<4x8x24xf32, #tpu.memory_space<vmem>>, vector<1x8x24xf32>
    %165 = vector.shape_cast %164 : vector<1x8x24xf32> to vector<8x24xf32>
    %cst_81 = arith.constant dense<0.000000e+00> : vector<8x128xf32>
    %166 = tpu.matmul %165, %163, %cst_81 {dimension_numbers = #tpu.dot_dimension_numbers<[1], [0], [0], [1], [0, 0, 1, 1], [], []>} : vector<8x24xf32>, vector<24x128xf32>, vector<8x128xf32> -> vector<8x128xf32>
    %c2_82 = arith.constant 2 : index
    %c0_83 = arith.constant 0 : index
    %c0_84 = arith.constant 0 : index
    %167 = vector.load %arg5[%c2_82, %c0_83, %c0_84] : memref<4x8x1xf32, #tpu.memory_space<vmem>>, vector<1x8x1xf32>
    %168 = vector.shape_cast %167 : vector<1x8x1xf32> to vector<8x1xf32>
    %169 = vector.broadcast %168 : vector<8x1xf32> to vector<8x128xf32>
    %170 = arith.addf %166, %169 : vector<8x128xf32>
    %cst_85 = arith.constant 0.000000e+00 : f32
    %171 = vector.broadcast %cst_85 : f32 to vector<8x128xf32>
    %172 = arith.maximumf %170, %171 : vector<8x128xf32>
    %173 = arith.addf %124, %172 : vector<8x128xf32>
    %cst_86 = arith.constant 0.000000e+00 : f32
    %174 = vector.broadcast %cst_86 : f32 to vector<8x128xf32>
    %175 = arith.maximumf %173, %174 : vector<8x128xf32>
    %c8_i32_87 = arith.constant 8 : i32
    %176 = tpu.dynamic_rotate %175 by %c8_i32_87 dim 1 : vector<8x128xf32>, i32 -> vector<8x128xf32>
    %c8_i32_88 = arith.constant 8 : i32
    %177 = vector.broadcast %c8_i32_88 : i32 to vector<1x128xi32>
    %178 = arith.cmpi sge, %20, %177 : vector<1x128xi32>
    %cst_89 = arith.constant 0.000000e+00 : f32
    %179 = vector.shape_cast %178 : vector<1x128xi1> to vector<1x128xi1>
    %180 = vector.broadcast %179 : vector<1x128xi1> to vector<8x128xi1>
    %181 = vector.broadcast %cst_89 : f32 to vector<8x128xf32>
    %182 = arith.select %180, %176, %181 : vector<8x128xi1>, vector<8x128xf32>
    %183 = tpu.concatenate %182, %175 in 0 : vector<8x128xf32>, vector<8x128xf32> -> vector<16x128xf32>
    %c3 = arith.constant 3 : index
    %c0_90 = arith.constant 0 : index
    %c0_91 = arith.constant 0 : index
    %184 = vector.load %arg2[%c3, %c0_90, %c0_91] : memref<4x8x24xf32, #tpu.memory_space<vmem>>, vector<1x8x24xf32>
    %185 = vector.shape_cast %184 : vector<1x8x24xf32> to vector<8x24xf32>
    %186 = vector.extract_strided_slice %185 {offsets = [0, 8], sizes = [8, 16], strides = [1, 1]} : vector<8x24xf32> to vector<8x16xf32>
    %cst_92 = arith.constant dense<0.000000e+00> : vector<8x128xf32>
    %187 = tpu.matmul %186, %183, %cst_92 {dimension_numbers = #tpu.dot_dimension_numbers<[1], [0], [0], [1], [0, 0, 1, 1], [], []>} : vector<8x16xf32>, vector<16x128xf32>, vector<8x128xf32> -> vector<8x128xf32>
    %c3_93 = arith.constant 3 : index
    %c0_94 = arith.constant 0 : index
    %c0_95 = arith.constant 0 : index
    %188 = vector.load %arg3[%c3_93, %c0_94, %c0_95] : memref<4x8x1xf32, #tpu.memory_space<vmem>>, vector<1x8x1xf32>
    %189 = vector.shape_cast %188 : vector<1x8x1xf32> to vector<8x1xf32>
    %190 = vector.broadcast %189 : vector<8x1xf32> to vector<8x128xf32>
    %191 = arith.addf %187, %190 : vector<8x128xf32>
    %cst_96 = arith.constant 0.000000e+00 : f32
    %192 = vector.broadcast %cst_96 : f32 to vector<8x128xf32>
    %193 = arith.maximumf %191, %192 : vector<8x128xf32>
    %c8_i32_97 = arith.constant 8 : i32
    %194 = tpu.dynamic_rotate %193 by %c8_i32_97 dim 1 : vector<8x128xf32>, i32 -> vector<8x128xf32>
    %c8_i32_98 = arith.constant 8 : i32
    %195 = vector.broadcast %c8_i32_98 : i32 to vector<1x128xi32>
    %196 = arith.cmpi sge, %20, %195 : vector<1x128xi32>
    %cst_99 = arith.constant 0.000000e+00 : f32
    %197 = vector.shape_cast %196 : vector<1x128xi1> to vector<1x128xi1>
    %198 = vector.broadcast %197 : vector<1x128xi1> to vector<8x128xi1>
    %199 = vector.broadcast %cst_99 : f32 to vector<8x128xf32>
    %200 = arith.select %198, %194, %199 : vector<8x128xi1>, vector<8x128xf32>
    %201 = tpu.concatenate %200, %193 in 0 : vector<8x128xf32>, vector<8x128xf32> -> vector<16x128xf32>
    %c3_100 = arith.constant 3 : index
    %c0_101 = arith.constant 0 : index
    %c0_102 = arith.constant 0 : index
    %202 = vector.load %arg4[%c3_100, %c0_101, %c0_102] : memref<4x8x24xf32, #tpu.memory_space<vmem>>, vector<1x8x24xf32>
    %203 = vector.shape_cast %202 : vector<1x8x24xf32> to vector<8x24xf32>
    %204 = vector.extract_strided_slice %203 {offsets = [0, 8], sizes = [8, 16], strides = [1, 1]} : vector<8x24xf32> to vector<8x16xf32>
    %cst_103 = arith.constant dense<0.000000e+00> : vector<8x128xf32>
    %205 = tpu.matmul %204, %201, %cst_103 {dimension_numbers = #tpu.dot_dimension_numbers<[1], [0], [0], [1], [0, 0, 1, 1], [], []>} : vector<8x16xf32>, vector<16x128xf32>, vector<8x128xf32> -> vector<8x128xf32>
    %c3_104 = arith.constant 3 : index
    %c0_105 = arith.constant 0 : index
    %c0_106 = arith.constant 0 : index
    %206 = vector.load %arg5[%c3_104, %c0_105, %c0_106] : memref<4x8x1xf32, #tpu.memory_space<vmem>>, vector<1x8x1xf32>
    %207 = vector.shape_cast %206 : vector<1x8x1xf32> to vector<8x1xf32>
    %208 = vector.broadcast %207 : vector<8x1xf32> to vector<8x128xf32>
    %209 = arith.addf %205, %208 : vector<8x128xf32>
    %cst_107 = arith.constant 0.000000e+00 : f32
    %210 = vector.broadcast %cst_107 : f32 to vector<8x128xf32>
    %211 = arith.maximumf %209, %210 : vector<8x128xf32>
    %212 = arith.addf %175, %211 : vector<8x128xf32>
    %cst_108 = arith.constant 0.000000e+00 : f32
    %213 = vector.broadcast %cst_108 : f32 to vector<8x128xf32>
    %214 = arith.maximumf %212, %213 : vector<8x128xf32>
    %c0_109 = arith.constant 0 : index
    %c0_110 = arith.constant 0 : index
    %215 = vector.load %arg6[%c0_109, %c0_110] : memref<8x8xf32, #tpu.memory_space<vmem>>, vector<8x8xf32>
    %cst_111 = arith.constant dense<0.000000e+00> : vector<8x128xf32>
    %216 = tpu.matmul %215, %214, %cst_111 {dimension_numbers = #tpu.dot_dimension_numbers<[1], [0], [0], [1], [0, 0, 1, 1], [], []>} : vector<8x8xf32>, vector<8x128xf32>, vector<8x128xf32> -> vector<8x128xf32>
    %c0_112 = arith.constant 0 : index
    %c0_113 = arith.constant 0 : index
    %217 = vector.load %arg7[%c0_112, %c0_113] : memref<8x1xf32, #tpu.memory_space<vmem>>, vector<8x1xf32>
    %218 = vector.broadcast %217 : vector<8x1xf32> to vector<8x128xf32>
    %219 = arith.addf %216, %218 : vector<8x128xf32>
    %c0_114 = arith.constant 0 : index
    %c0_115 = arith.constant 0 : index
    %220 = vector.load %arg10[%c0_114, %c0_115] : memref<128x8xf32, #tpu.memory_space<vmem>>, vector<128x8xf32>
    %c0_116 = arith.constant 0 : index
    %c0_117 = arith.constant 0 : index
    %221 = vector.load %arg11[%c0_116, %c0_117] : memref<8x128xf32, #tpu.memory_space<vmem>>, vector<8x128xf32>
    %cst_118 = arith.constant dense<0.000000e+00> : vector<8x8xf32>
    %222 = tpu.matmul %219, %220, %cst_118 {dimension_numbers = #tpu.dot_dimension_numbers<[1], [0], [0], [1], [0, 0, 1, 1], [], []>} : vector<8x128xf32>, vector<128x8xf32>, vector<8x8xf32> -> vector<8x8xf32>
    %cst_119 = arith.constant 6.250000e-02 : f32
    %223 = vector.broadcast %cst_119 : f32 to vector<8x8xf32>
    %224 = arith.mulf %222, %223 : vector<8x8xf32>
    %cst_120 = arith.constant dense<0.000000e+00> : vector<8x128xf32>
    %225 = tpu.matmul %224, %221, %cst_120 {dimension_numbers = #tpu.dot_dimension_numbers<[1], [0], [0], [1], [0, 0, 1, 1], [], []>} : vector<8x8xf32>, vector<8x128xf32>, vector<8x128xf32> -> vector<8x128xf32>
    %226 = arith.subf %219, %225 : vector<8x128xf32>
    %227 = arith.mulf %226, %226 : vector<8x128xf32>
    %cst_121 = arith.constant dense<0.000000e+00> : vector<8x8xf32>
    %228 = tpu.matmul %227, %220, %cst_121 {dimension_numbers = #tpu.dot_dimension_numbers<[1], [0], [0], [1], [0, 0, 1, 1], [], []>} : vector<8x128xf32>, vector<128x8xf32>, vector<8x8xf32> -> vector<8x8xf32>
    %cst_122 = arith.constant 6.250000e-02 : f32
    %229 = vector.broadcast %cst_122 : f32 to vector<8x8xf32>
    %230 = arith.mulf %228, %229 : vector<8x8xf32>
    %cst_123 = arith.constant 9.99999974E-6 : f32
    %231 = vector.broadcast %cst_123 : f32 to vector<8x8xf32>
    %232 = arith.addf %230, %231 : vector<8x8xf32>
    %233 = math.rsqrt %232 : vector<8x8xf32>
    %cst_124 = arith.constant dense<0.000000e+00> : vector<8x128xf32>
    %234 = tpu.matmul %233, %221, %cst_124 {dimension_numbers = #tpu.dot_dimension_numbers<[1], [0], [0], [1], [0, 0, 1, 1], [], []>} : vector<8x8xf32>, vector<8x128xf32>, vector<8x128xf32> -> vector<8x128xf32>
    %235 = arith.mulf %226, %234 : vector<8x128xf32>
    %c0_125 = arith.constant 0 : index
    %c0_126 = arith.constant 0 : index
    %236 = vector.load %arg8[%c0_125, %c0_126] : memref<8x1xf32, #tpu.memory_space<vmem>>, vector<8x1xf32>
    %237 = vector.broadcast %236 : vector<8x1xf32> to vector<8x128xf32>
    %238 = arith.mulf %235, %237 : vector<8x128xf32>
    %c0_127 = arith.constant 0 : index
    %c0_128 = arith.constant 0 : index
    %239 = vector.load %arg9[%c0_127, %c0_128] : memref<8x1xf32, #tpu.memory_space<vmem>>, vector<8x1xf32>
    %240 = vector.broadcast %239 : vector<8x1xf32> to vector<8x128xf32>
    %241 = arith.addf %238, %240 : vector<8x128xf32>
    %cst_129 = arith.constant 0.000000e+00 : f32
    %242 = vector.broadcast %cst_129 : f32 to vector<8x128xf32>
    %243 = arith.maximumf %241, %242 : vector<8x128xf32>
    %c0_130 = arith.constant 0 : index
    %c0_131 = arith.constant 0 : index
    %244 = vector.load %arg12[%c0_130, %c0_131] : memref<128x128xf32, #tpu.memory_space<vmem>>, vector<128x128xf32>
    %cst_132 = arith.constant dense<0.000000e+00> : vector<8x128xf32>
    %245 = tpu.matmul %243, %244, %cst_132 {dimension_numbers = #tpu.dot_dimension_numbers<[1], [0], [0], [1], [0, 0, 1, 1], [], []>} : vector<8x128xf32>, vector<128x128xf32>, vector<8x128xf32> -> vector<8x128xf32>
    %c0_133 = arith.constant 0 : index
    %c0_134 = arith.constant 0 : index
    %246 = vector.load %arg13[%c0_133, %c0_134] : memref<1x128xf32, #tpu.memory_space<vmem>>, vector<1x128xf32>
    %247 = vector.broadcast %246 : vector<1x128xf32> to vector<8x128xf32>
    %248 = arith.addf %245, %247 : vector<8x128xf32>
    %c0_135 = arith.constant 0 : index
    %c0_136 = arith.constant 0 : index
    %c0_137 = arith.constant 0 : index
    %249 = vector.load %arg14[%c0_135, %c0_136, %c0_137] : memref<1x8x128xf32, #tpu.memory_space<vmem>>, vector<1x8x128xf32>
    %250 = vector.shape_cast %249 : vector<1x8x128xf32> to vector<8x128xf32>
    %251 = vector.shape_cast %248 : vector<8x128xf32> to vector<1x8x128xf32>
    tpu.vector_store %arg14[%c0_135, %c0_136, %c0_137], %251 {strides = array<i32>} : memref<1x8x128xf32, #tpu.memory_space<vmem>>, vector<1x8x128xf32>,
    return
  }
  func.func @transform_0(%arg0: i32) -> (i32, i32, i32) {
    %c0_i32 = arith.constant 0 : i32
    %c0_i32_0 = arith.constant 0 : i32
    %c0_i32_1 = arith.constant 0 : i32
    return %arg0, %c0_i32, %c0_i32_0 : i32, i32, i32
  }
  func.func @transform_1(%arg0: i32) -> (i32, i32, i32) {
    %c0_i32 = arith.constant 0 : i32
    %c0_i32_0 = arith.constant 0 : i32
    %c0_i32_1 = arith.constant 0 : i32
    %c0_i32_2 = arith.constant 0 : i32
    return %c0_i32, %c0_i32_0, %c0_i32_1 : i32, i32, i32
  }
  func.func @transform_2(%arg0: i32) -> (i32, i32, i32) {
    %c0_i32 = arith.constant 0 : i32
    %c0_i32_0 = arith.constant 0 : i32
    %c0_i32_1 = arith.constant 0 : i32
    %c0_i32_2 = arith.constant 0 : i32
    return %c0_i32, %c0_i32_0, %c0_i32_1 : i32, i32, i32
  }
  func.func @transform_3(%arg0: i32) -> (i32, i32, i32) {
    %c0_i32 = arith.constant 0 : i32
    %c0_i32_0 = arith.constant 0 : i32
    %c0_i32_1 = arith.constant 0 : i32
    %c0_i32_2 = arith.constant 0 : i32
    return %c0_i32, %c0_i32_0, %c0_i32_1 : i32, i32, i32
  }
  func.func @transform_4(%arg0: i32) -> (i32, i32, i32) {
    %c0_i32 = arith.constant 0 : i32
    %c0_i32_0 = arith.constant 0 : i32
    %c0_i32_1 = arith.constant 0 : i32
    %c0_i32_2 = arith.constant 0 : i32
    return %c0_i32, %c0_i32_0, %c0_i32_1 : i32, i32, i32
  }
  func.func @transform_5(%arg0: i32) -> (i32, i32) {
    %c0_i32 = arith.constant 0 : i32
    %c0_i32_0 = arith.constant 0 : i32
    %c0_i32_1 = arith.constant 0 : i32
    return %c0_i32, %c0_i32_0 : i32, i32
  }
  func.func @transform_6(%arg0: i32) -> (i32, i32) {
    %c0_i32 = arith.constant 0 : i32
    %c0_i32_0 = arith.constant 0 : i32
    %c0_i32_1 = arith.constant 0 : i32
    return %c0_i32, %c0_i32_0 : i32, i32
  }
  func.func @transform_7(%arg0: i32) -> (i32, i32) {
    %c0_i32 = arith.constant 0 : i32
    %c0_i32_0 = arith.constant 0 : i32
    %c0_i32_1 = arith.constant 0 : i32
    return %c0_i32, %c0_i32_0 : i32, i32
  }
  func.func @transform_8(%arg0: i32) -> (i32, i32) {
    %c0_i32 = arith.constant 0 : i32
    %c0_i32_0 = arith.constant 0 : i32
    %c0_i32_1 = arith.constant 0 : i32
    return %c0_i32, %c0_i32_0 : i32, i32
  }
  func.func @transform_9(%arg0: i32) -> (i32, i32) {
    %c0_i32 = arith.constant 0 : i32
    %c0_i32_0 = arith.constant 0 : i32
    %c0_i32_1 = arith.constant 0 : i32
    return %c0_i32, %c0_i32_0 : i32, i32
  }
  func.func @transform_10(%arg0: i32) -> (i32, i32) {
    %c0_i32 = arith.constant 0 : i32
    %c0_i32_0 = arith.constant 0 : i32
    %c0_i32_1 = arith.constant 0 : i32
    return %c0_i32, %c0_i32_0 : i32, i32
  }
  func.func @transform_11(%arg0: i32) -> (i32, i32) {
    %c0_i32 = arith.constant 0 : i32
    %c0_i32_0 = arith.constant 0 : i32
    %c0_i32_1 = arith.constant 0 : i32
    return %c0_i32, %c0_i32_0 : i32, i32
  }
  func.func @transform_12(%arg0: i32) -> (i32, i32) {
    %c0_i32 = arith.constant 0 : i32
    %c0_i32_0 = arith.constant 0 : i32
    %c0_i32_1 = arith.constant 0 : i32
    return %c0_i32, %c0_i32_0 : i32, i32
  }
  func.func @transform_13(%arg0: i32) -> (i32, i32, i32) {
    %c0_i32 = arith.constant 0 : i32
    %c0_i32_0 = arith.constant 0 : i32
    %c0_i32_1 = arith.constant 0 : i32
    return %arg0, %c0_i32, %c0_i32_0 : i32, i32, i32
  }
}

</mosaic_0001>

<bundles_post_ra>
// kernel: tpu_custom_call.1
= control target key start
LH: loop header
LB: loop body
LE: loop exit
PB: predicated region body
PF: predicated region fallthrough
CT: control target
= control target key end

     0   :  { %s2743_s0 = inlined_call_operand.vmem [shape: f32[2,8,128], index: 0, kind: input, shape index: {}]   ;;  %s2744_s1 = inlined_call_operand.vmem [shape: f32[4,8,24], index: 1, kind: input, shape index: {}]   ;;  %s2745_s2 = inlined_call_operand.vmem [shape: f32[4,8,1], index: 2, kind: input, shape index: {}]   ;;  %s2746_s3 = inlined_call_operand.vmem [shape: f32[4,8,24], index: 3, kind: input, shape index: {}]   ;;  %s2747_s4 = inlined_call_operand.vmem [shape: f32[4,8,1], index: 4, kind: input, shape index: {}]   ;;  %s2748_s5 = inlined_call_operand.vmem [shape: f32[8,8], index: 5, kind: input, shape index: {}]   ;;  %s2749_s6 = inlined_call_operand.vmem [shape: f32[8,1], index: 6, kind: input, shape index: {}]   ;;  %s2750_s7 = inlined_call_operand.vmem [shape: f32[8,1], index: 7, kind: input, shape index: {}]   ;;  %s2751_s8 = inlined_call_operand.vmem [shape: f32[8,1], index: 8, kind: input, shape index: {}]   ;;  %s2752_s9 = inlined_call_operand.vmem [shape: f32[128,8], index: 9, kind: input, shape index: {}]   ;;  %s2753_s10 = inlined_call_operand.vmem [shape: f32[8,128], index: 10, kind: input, shape index: {}]   ;;  %s2754_s11 = inlined_call_operand.vmem [shape: f32[128,128], index: 11, kind: input, shape index: {}]   ;;  %s2755_s12 = inlined_call_operand.vmem [shape: f32[1,128], index: 12, kind: input, shape index: {}]   ;;  %s2756_s13 = inlined_call_operand.hbm [shape: f32[2,8,128], index: 13, kind: output, shape index: {}]  }
   0x1   :  { %2758 = sst [smem:[#allocation5_spill]] %s2743_s0 }
   0x2   :  { %2759 = sst [smem:[#allocation6_spill]] %s2744_s1 }
   0x3   :  { %2760 = sst [smem:[#allocation7_spill]] %s2745_s2 }
   0x4   :  { %2761 = sst [smem:[#allocation8_spill]] %s2746_s3 }
   0x5   :  { %18 = vsyncpa [#allocation3], 0 }
   0x6   :  { %20 = vsyncpa [#allocation3 + $0x1], 0  ;;  %s2269_s25 = smov 0   ;;  %s2271_s26 = smov 0  }
   0x7   :  { %s2273_s27 = smov 0   ;;  %s2275_s28 = smov 0  }
   0x8 LB: > { %s2290_s29 = sadd.s32 4294967295, %s2188_s28   ;;  %s1754_s30 = sadd.s32 4294967294, %s2188_s28   ;;  %s2188_s28 = sphi %s2275_s28, %s2772_s28   ;;  %s2184_s27 = sphi %s2273_s27, %s2771_s27   ;;  %s2180_s26 = sphi %s2271_s26, %s2770_s26   ;;  %s2176_s25 = sphi %s2269_s25, %s2769_s25  }
   0x9   : > { %s2294_s14 = sadd.s32 1, %s2188_s28   ;;  %s311_s15 = sadd.s32 1, %s2184_s27 }
   0xa   : > { %s308_s16 = ssub.s32 %s2188_s28, %s2294_s14  ;;  %p321_p0 = scmp.ne.s32.totalorder %s2184_s27, %s2180_s26 }
   0xb   : > { %p309_p1 = scmp.eq.s32.totalorder %s308_s16, 0  ;;  %p322_p2 = scmp.eq.s32.totalorder %s2290_s29, 1 }
   0xc   : > { %p327_p3 = scmp.ne.s32.totalorder %s2180_s26, %s2176_s25  ;;  %p328_p4 = scmp.eq.s32.totalorder %s1754_s30, 1 }
   0xd   : > { %s2305_s17 = scalar_select %p309_p1, %s2184_s27, %s311_s15  }
   0xe   : > { %p2307_p5 = por %p322_p2, %p321_p0  ;;  %p2311_p6 = por %p328_p4, %p327_p3 }
   0xf   : > { %p1757_p7 = scmp.ge.s32.totalorder %s2188_s28, 1  ;;  %p389_p8 = scmp.lt.s32.totalorder %s2188_s28, 3 }
  0x11   : > { %p390_p9 = pnand %p1757_p7, %p389_p8 }
  0x12   : > { %p432_p10 = scmp.lt.s32.totalorder (!%p390_p9), %s2290_s29, 1  ;;  %s2764_s2 = sld [smem:[#allocation7_spill]] (!%p390_p9) }
  0x13   : > { %393 = sbr.rel (%p390_p9) target bundleno = 3773 (0xebd), region = 72  ;;  %s2765_s0 = sld [smem:[#allocation5_spill]] (!%p390_p9) }
  0x14   : > { %s2193_s16 = smov (!%p390_p9), 1   ;;  %s2194_s20 = smov (!%p390_p9), 2  }
  0x15   : > { %s2766_s1 = sld [smem:[#allocation6_spill]] (!%p390_p9)  ;;  %s2198_s21 = smov (!%p390_p9), [#allocation2]  }
  0x16   : > { %s2767_s3 = sld [smem:[#allocation8_spill]] (!%p390_p9) }
  0x18   : > { %v2190_v0 = vmov 0.0   ;;  %vm2191_vm0 = vmmov 0   ;;  %v466_v1 = vld [vmem:[%s2764_s2] sm:$0xff]  ;;  %s433_s22 = scalar_select %p432_p10, %s2290_s29, 1  ;;  %v2192_v2 = vmov 0   ;;  %v436_v4 = vlaneseq  ;;  %v1767_v27 = vld [vmem:[%s2764_s2 + $0x8] sm:$0xff] }
  0x19   : > { %1889 = vmatprep.subr.mxu0 %v2190_v0  ;;  %1895 = vmatprep.mubr.msk.f32.mxu0 %vm2191_vm0, %v2190_v0  ;;  %vm472_vm4 = vcmask 195584   ;;  %v554_v16 = vld [vmem:[%s2747_s4] sm:$0xff]  ;;  %v1772_v28 = vld [vmem:[%s2747_s4 + $0x8] sm:$0xff]  ;;  %v1777_v47 = vld [vmem:[%s2764_s2 + $0x10] sm:$0xff]  ;;  %vm1017_vm7 = vcmask 130048   ;;  %vm1188_vm8 = vcmask 64512  }
  0x1a   : > { %2124 = vset.pattern.permute.xlu1 %v2192_v2  ;;  %2125 = vset.pattern.permute.xlu0 %v2192_v2  ;;  %s1759_s23 = sshll.u32 %s433_s22, 3  ;;  %v437_v5 = vand.u32 127, %v436_v4  ;;  %v1782_v56 = vld [vmem:[%s2747_s4 + $0x10] sm:$0xff] }
  0x1b   : > { %469 = vperm.xlu1 %2124, %v466_v1   ;;  %1934 = vmatprep.subr.mxu1 %v2190_v0  ;;  %s435_s15 = scalar_lea.vmem %s2765_s0, %s1759_s23  ;;  %v465_v9 = vld [vmem:[%s2766_s1] sm:$0xff]  ;;  %v1766_v30 = vld [vmem:[%s2766_s1 + $0x8] sm:$0xff]  ;;  %v1776_v49 = vld [vmem:[%s2766_s1 + $0x10] sm:$0xff]  ;;  %s2768_s0 = smov 8  }
  0x1c   : > { %1940 = vmatprep.mubr.msk.f32.mxu1 %vm2191_vm0, %v2190_v0  ;;  %v452_v3 = vld [vmem:[%s435_s15] sm:$0xff]  ;;  %v443_v6 = vand.u32 15, %v437_v5  ;;  %vm438_vm1 = vcmp.lt.s32.totalorder %v437_v5, 16  ;;  %v1771_v38 = vld [vmem:[%s2767_s3 + $0x8] sm:$0xff]  ;;  %v1781_v58 = vld [vmem:[%s2767_s3 + $0x10] sm:$0xff]  ;;  %s2197_s15 = smov 120  }
  0x1d   : > { %459 = vrot.lane.b32.xlu0 %v452_v3, %s2193_s16  ;;  %1890 = vmatpush3.msra.mxu0 %v452_v3  ;;  %v553_v18 = vld [vmem:[%s2767_s3] sm:$0xff]  ;;  %v1786_v60 = vld [vmem:[%s2766_s1 + $0x18] sm:$0xff]  ;;  %s1799_s23 = sshll.u32 %s2290_s29, 7  ;;  %s2132_s29 = sshll.u32 %s2198_s21, 4  ;;  %s2133_s29 = int_to_ptr.vmem [resolvable:$false] %s2132_s29 }
  0x1e   : > { %1891 = vmatprep.subr.mxu0 %v2190_v0  ;;  %v2333_v7 = vsel %vm438_vm1, %v443_v6, 4294967295  ;;  %v1787_v5 = vld [vmem:[%s2764_s2 + $0x18] sm:$0xff]  ;;  %s2708_s1 = scalar_lea.hbm %s2756_s13, %s1799_s23 }
  0x1f   : > { %vm461_vm2 = vcmp.ge.s32.totalorder %v2333_v7, 1  ;;  %vm455_vm3 = vcmp.ge.s32.totalorder %v2333_v7, 2  ;;  %vm638_vm5 = vcmp.ge.s32.totalorder %v2333_v7, 4  ;;  %vm821_vm6 = vcmp.ge.s32.totalorder %v2333_v7, 8  ;;  %v1790_v6 = vld [vmem:[%s2767_s3 + $0x18] sm:$0xff]  ;;  %v2496_v7 = vld [vmem:[%s2752_s9 + $0x68] sm:$0xff] }
  0x21   : > { %453 = vrot.lane.b32.xlu0 %v452_v3, %s2194_s20 }
  0x8f   : > { %v460_v8 = vpop.permute.xlu0 %459 }
  0x90   : > { %1892 = vmatpush3.msk.msra.mxu0 %vm461_vm2, %v460_v8  ;;  %v1182_v8 = vld [vmem:[%s2749_s6] sm:$0xff] }
  0x91   : > { %1893 = vmatprep.subr.mxu0 %v2190_v0 }
  0x93   : > { %v454_v10 = vpop.permute.xlu0 %453 }
  0x94   : > { %1894 = vmatpush3.msk.msra.mxu0 %vm455_vm3, %v454_v10 }
  0x95   : > { %1896 = vmatmul.mubr.msk.f32.vlgmr.msra.gmra.mxu0 %vm472_vm4, %v465_v9  ;;  %1898 = vmatprep.subr.mxu0 %v2190_v0  ;;  %v1579_v9 = vld [vmem:[%s2751_s8] sm:$0xff] }
  0x96   : > { %1904 = vmatprep.mubr.msk.f32.mxu0 %vm2191_vm0, %v2190_v0  ;;  %v470_v11 = vpop.permute.xlu1 %469 }
 0x155   : > { %v542_v12 = vpop.f32.mrf.mxu0 }
 0x156   : > { %v543_v13 = vadd.f32 %v542_v12, %v470_v11 }
 0x157   : > { %v1897_v14 = vpop.f32.mrf.mxu0 }
 0x158   : > { %v546_v15 = vmax.f32 %v543_v13, 0.0 }
 0x15a   : > { %547 = vrot.lane.b32.xlu0 %v546_v15, %s2194_s20  ;;  %550 = vrot.lane.b32.xlu1 %v546_v15, %s2193_s16  ;;  %s2195_s16 = smov 4  }
 0x15b   : > { %1899 = vmatpush3.msra.mxu0 %v546_v15 }
 0x15c   : > { %1900 = vmatprep.subr.mxu0 %v2190_v0 }
 0x15e   : > { %557 = vperm.xlu1 %2124, %v554_v16  }
 0x1cc   : > { %v551_v17 = vpop.permute.xlu1 %550  ;;  %v548_v19 = vpop.permute.xlu0 %547 }
 0x1cd   : > { %1901 = vmatpush3.msk.msra.mxu0 %vm461_vm2, %v551_v17  ;;  %v1791_v17 = vld [vmem:[%s2747_s4 + $0x18] sm:$0xff] }
 0x1ce   : > { %1902 = vmatprep.subr.mxu0 %v2190_v0 }
 0x1cf   : > { %1903 = vmatpush3.msk.msra.mxu0 %vm455_vm3, %v548_v19 }
 0x1d0   : > { %1905 = vmatmul.mubr.msk.f32.vlgmr.msra.gmra.mxu0 %vm472_vm4, %v553_v18  ;;  %1907 = vmatprep.subr.mxu0 %v2190_v0  ;;  %v1572_v18 = vld [vmem:[%s2750_s7] sm:$0xff] }
 0x1d1   : > { %1913 = vmatprep.mubr.msk.f32.mxu0 %vm2191_vm0, %v2190_v0 }
 0x1d9   : > { %v558_v20 = vpop.permute.xlu1 %557 }
 0x290   : > { %v629_v21 = vpop.f32.mrf.mxu0 }
 0x291   : > { %v630_v22 = vadd.f32 %v629_v21, %v558_v20  ;;  %v2484_v21 = vld [vmem:[%s2752_s9 + $0x78] sm:$0xff] }
 0x292   : > { %v1906_v23 = vpop.f32.mrf.mxu0 }
 0x293   : > { %v633_v24 = vmax.f32 %v630_v22, 0.0  ;;  %v2489_v22 = vld [vmem:[%s2752_s9 + $0x70] sm:$0xff]  ;;  %v2503_v23 = vld [vmem:[%s2752_s9 + $0x60] sm:$0xff] }
 0x295   : > { %v634_v25 = vadd.f32 %v633_v24, %v452_v3  ;;  %v2510_v24 = vld [vmem:[%s2752_s9 + $0x58] sm:$0xff] }
 0x297   : > { %v635_v26 = vmax.f32 %v634_v25, 0.0  ;;  %v2517_v25 = vld [vmem:[%s2752_s9 + $0x50] sm:$0xff] }
 0x299   : > { %636 = vrot.lane.b32.xlu1 %v635_v26, %s2195_s16  ;;  %642 = vrot.lane.b32.xlu0 %v635_v26, %s2194_s20 }
 0x29a   : > { %1908 = vmatpush3.msra.mxu0 %v635_v26 }
 0x29b   : > { %1909 = vmatprep.subr.mxu0 %v2190_v0 }
 0x29d   : > { %651 = vperm.xlu0 %2125, %v1767_v27   ;;  %v2531_v27 = vld [vmem:[%s2752_s9 + $0x40] sm:$0xff] }
 0x2a1   : > { %740 = vperm.xlu0 %2125, %v1772_v28   ;;  %v2538_v28 = vld [vmem:[%s2752_s9 + $0x38] sm:$0xff] }
 0x30b   : > { %v643_v29 = vpop.permute.xlu0 %642  ;;  %v637_v31 = vpop.permute.xlu1 %636 }
 0x30c   : > { %1910 = vmatpush3.msk.msra.mxu0 %vm455_vm3, %v643_v29  ;;  %v2545_v29 = vld [vmem:[%s2752_s9 + $0x30] sm:$0xff] }
 0x30d   : > { %1911 = vmatprep.subr.mxu0 %v2190_v0 }
 0x30e   : > { %1912 = vmatpush3.msk.msra.mxu0 %vm638_vm5, %v637_v31  ;;  %v2559_v31 = vld [vmem:[%s2752_s9 + $0x20] sm:$0xff] }
 0x30f   : > { %1914 = vmatmul.mubr.msk.f32.vlgmr.msra.gmra.mxu0 %vm472_vm4, %v1766_v30  ;;  %1916 = vmatprep.subr.mxu0 %v2190_v0  ;;  %v2552_v30 = vld [vmem:[%s2752_s9 + $0x28] sm:$0xff] }
 0x310   : > { %1922 = vmatprep.mubr.msk.f32.mxu0 %vm2191_vm0, %v2190_v0 }
 0x318   : > { %v652_v32 = vpop.permute.xlu0 %651 }
 0x31c   : > { %v741_v40 = vpop.permute.xlu0 %740 }
 0x3cf   : > { %v723_v33 = vpop.f32.mrf.mxu0 }
 0x3d0   : > { %v724_v34 = vadd.f32 %v723_v33, %v652_v32  ;;  %v2566_v32 = vld [vmem:[%s2752_s9 + $0x18] sm:$0xff]  ;;  %v2573_v33 = vld [vmem:[%s2752_s9 + $0x10] sm:$0xff] }
 0x3d1   : > { %v1915_v35 = vpop.f32.mrf.mxu0 }
 0x3d2   : > { %v727_v36 = vmax.f32 %v724_v34, 0.0 }
 0x3d4   : > { %731 = vrot.lane.b32.xlu1 %v727_v36, %s2194_s20  ;;  %1917 = vmatpush3.msra.mxu0 %v727_v36  ;;  %s2757_s20 = smov 8  }
 0x3d5   : > { %1918 = vmatprep.subr.mxu0 %v2190_v0 }
 0x3d8   : > { %728 = vrot.lane.b32.xlu1 %v727_v36, %s2195_s16 }
 0x446   : > { %v732_v37 = vpop.permute.xlu1 %731 }
 0x447   : > { %1919 = vmatpush3.msk.msra.mxu0 %vm455_vm3, %v732_v37 }
 0x448   : > { %1920 = vmatprep.subr.mxu0 %v2190_v0 }
 0x44a   : > { %v729_v39 = vpop.permute.xlu1 %728 }
 0x44b   : > { %1921 = vmatpush3.msk.msra.mxu0 %vm638_vm5, %v729_v39 }
 0x44c   : > { %1923 = vmatmul.mubr.msk.f32.vlgmr.msra.gmra.mxu0 %vm472_vm4, %v1771_v38  ;;  %1925 = vmatprep.subr.mxu0 %v2190_v0 }
 0x44d   : > { %1931 = vmatprep.mubr.msk.f32.mxu0 %vm2191_vm0, %v2190_v0 }
 0x50c   : > { %v812_v41 = vpop.f32.mrf.mxu0 }
 0x50d   : > { %v813_v42 = vadd.f32 %v812_v41, %v741_v40  ;;  %v1181_v41 = vld [vmem:[%s2748_s5] sm:$0xff] }
 0x50e   : > { %v1924_v43 = vpop.f32.mrf.mxu0 }
 0x50f   : > { %v816_v44 = vmax.f32 %v813_v42, 0.0  ;;  %v1263_v42 = vld [vmem:[%s2752_s9 + $0x8] sm:$0xff]  ;;  %v1262_v43 = vld [vmem:[%s2752_s9] sm:$0xff] }
 0x511   : > { %v817_v45 = vadd.f32 %v816_v44, %v635_v26  ;;  %v2524_v26 = vld [vmem:[%s2752_s9 + $0x48] sm:$0xff] }
 0x513   : > { %v818_v46 = vmax.f32 %v817_v45, 0.0 }
 0x515   : > { %819 = vrot.lane.b32.xlu0 %v818_v46, %s2757_s20  ;;  %825 = vrot.lane.b32.xlu1 %v818_v46, %s2195_s16 }
 0x516   : > { %1926 = vmatpush3.msra.mxu0 %v818_v46 }
 0x517   : > { %1927 = vmatprep.subr.mxu0 %v2190_v0 }
 0x519   : > { %834 = vperm.xlu1 %2124, %v1777_v47  }
 0x587   : > { %v826_v48 = vpop.permute.xlu1 %825  ;;  %v820_v50 = vpop.permute.xlu0 %819 }
 0x588   : > { %1928 = vmatpush3.msk.msra.mxu0 %vm638_vm5, %v826_v48  ;;  %v1278_v48 = vld [vmem:[%s2753_s10] sm:$0xff] }
 0x589   : > { %1929 = vmatprep.subr.mxu0 %v2190_v0 }
 0x58a   : > { %1930 = vmatpush3.msk.msra.mxu0 %vm821_vm6, %v820_v50 }
 0x58b   : > { %1932 = vmatmul.mubr.msk.f32.vlgmr.msra.gmra.mxu0 %vm472_vm4, %v1776_v49  ;;  %1943 = vmatprep.subr.mxu0 %v2190_v0 }
 0x58c   : > { %1947 = vmatprep.mubr.msk.f32.mxu0 %vm2191_vm0, %v2190_v0 }
 0x594   : > { %v835_v51 = vpop.permute.xlu1 %834 }
 0x64b   : > { %v906_v52 = vpop.f32.mrf.mxu0 }
 0x64c   : > { %v907_v53 = vadd.f32 %v906_v52, %v835_v51 }
 0x64d   : > { %v1933_v54 = vpop.f32.mrf.mxu0 }
 0x64e   : > { %v910_v55 = vmax.f32 %v907_v53, 0.0 }
 0x650   : > { %911 = vrot.lane.b32.xlu1 %v910_v55, %s2757_s20  ;;  %914 = vrot.lane.b32.xlu0 %v910_v55, %s2195_s16 }
 0x651   : > { %1935 = vmatpush3.msra.mxu1 %v910_v55 }
 0x652   : > { %1936 = vmatprep.subr.mxu1 %v2190_v0 }
 0x654   : > { %923 = vperm.xlu0 %2125, %v1782_v56  }
 0x658   : > { %1015 = vrot.lane.b32.xlu0 %v1786_v60, %s2197_s15  ;;  %v1602_v60 = vld [vmem:[%s2754_s11 + $0x78] sm:$0xff] }
 0x6c2   : > { %v915_v57 = vpop.permute.xlu0 %914  ;;  %v912_v59 = vpop.permute.xlu1 %911 }
 0x6c3   : > { %1937 = vmatpush3.msk.msra.mxu1 %vm638_vm5, %v915_v57 }
 0x6c4   : > { %1938 = vmatprep.subr.mxu1 %v2190_v0 }
 0x6c5   : > { %1939 = vmatpush3.msk.msra.mxu1 %vm821_vm6, %v912_v59 }
 0x6c6   : > { %1941 = vmatmul.mubr.msk.f32.vlgmr.msra.gmra.mxu1 %vm472_vm4, %v1781_v58  ;;  %1950 = vmatprep.subr.mxu1 %v2190_v0 }
 0x6c7   : > { %1954 = vmatprep.mubr.msk.f32.mxu1 %vm2191_vm0, %v2190_v0 }
 0x6cf   : > { %v924_v61 = vpop.permute.xlu0 %923 }
 0x6d3   : > { %v1016_v10 = vpop.permute.xlu0 %1015 }
 0x786   : > { %v995_v62 = vpop.f32.mrf.mxu1 }
 0x787   : > { %v996_v63 = vadd.f32 %v995_v62, %v924_v61  ;;  %v1601_v62 = vld [vmem:[%s2754_s11 + $0x70] sm:$0xff] }
 0x788   : > { %v1942_v1 = vpop.f32.mrf.mxu1 }
 0x789   : > { %v999_v2 = vmax.f32 %v996_v63, 0.0  ;;  %v1600_v63 = vld [vmem:[%s2754_s11 + $0x68] sm:$0xff]  ;;  %v1599_v1 = vld [vmem:[%s2754_s11 + $0x60] sm:$0xff] }
 0x78b   : > { %v1000_v3 = vadd.f32 %v999_v2, %v818_v46  ;;  %v1598_v2 = vld [vmem:[%s2754_s11 + $0x58] sm:$0xff] }
 0x78d   : > { %v2443_v4 = vmax.f32 %v1000_v3, 0.0  ;;  %v1597_v3 = vld [vmem:[%s2754_s11 + $0x50] sm:$0xff] }
 0x78f   : > { %1002 = vrot.lane.b32.xlu1 %v2443_v4, %s2757_s20  ;;  %1944 = vmatpush3.msra.mxu0 %v2443_v4  ;;  %s429_s20 = sand.u32 1, %s2180_s26  }
 0x790   : > { %1945 = vmatprep.subr.mxu0 %v2190_v0  ;;  %s1682_s2 = scalar_lea.sflag [#allocation3], %s429_s20 }
 0x793   : > { %1011 = vperm.xlu1 %2124, %v1787_v5   ;;  %v1595_v5 = vld [vmem:[%s2754_s11 + $0x40] sm:$0xff] }
 0x797   : > { %1104 = vrot.lane.b32.xlu1 %v1790_v6, %s2197_s15  ;;  %v1594_v6 = vld [vmem:[%s2754_s11 + $0x38] sm:$0xff]  ;;  %s1758_s15 = sshll.u32 %s429_s20, 3 }
 0x798   : > { %s431_s24 = scalar_lea.vmem [#allocation2], %s1758_s15  ;;  %s2134_s15 = scalar_lea.vmem %s2133_s29, 256 }
 0x799   : > { %s1695_s16 = sshll.u32 %s431_s24, 4  ;;  %s1696_s16 = int_to_ptr.vmem [resolvable:$true] %s1695_s16 }
 0x79a   : > { %s2128_s3 = scalar_lea.vmem %s1696_s16, 128  ;;  %p2135_p0 = scmp.lt.s32.totalorder %s1696_s16, %s2133_s29 }
 0x79b   : > { %1185 = vperm.xlu1 %2124, %v1182_v8   ;;  %v1593_v8 = vld [vmem:[%s2754_s11 + $0x30] sm:$0xff]  ;;  %p2129_p11 = scmp.ne.s32.totalorder %s1696_s16, %s2128_s3  ;;  %p2136_p1 = scmp.lt.s32.totalorder %s2134_s15, %s2128_s3 }
 0x79d   : > { %p2130_p12 = pnand %p2129_p11, %p2307_p5  ;;  %p2137_p2 = por %p2136_p1, %p2135_p0 }
 0x79f   : > { %1582 = vperm.xlu1 %2124, %v1579_v9   ;;  %v1592_v9 = vld [vmem:[%s2754_s11 + $0x28] sm:$0xff]  ;;  %p2131_p13 = pneg %p2130_p12 }
 0x7a1   : > { %p2138_p3 = pnand %p2137_p2, %p2131_p13 }
 0x801   : > { %v1003_v11 = vpop.permute.xlu1 %1002 }
 0x802   : > { %1946 = vmatpush3.msk.msra.mxu0 %vm821_vm6, %v1003_v11  ;;  %v1590_v11 = vld [vmem:[%s2754_s11 + $0x18] sm:$0xff] }
 0x803   : > { %1948 = vmatmul.mubr.msk.f32.vlgmr.msra.gmra.mxu0 %vm1017_vm7, %v1016_v10  ;;  %1957 = vmatprep.subr.mxu0 %v2190_v0  ;;  %v1591_v10 = vld [vmem:[%s2754_s11 + $0x20] sm:$0xff] }
 0x804   : > { %1959 = vmatprep.mubr.msk.f32.mxu0 %vm2191_vm0, %v2190_v0 }
 0x80e   : > { %v1012_v12 = vpop.permute.xlu1 %1011 }
 0x812   : > { %v1105_v20 = vpop.permute.xlu1 %1104 }
 0x816   : > { %v1186_v44 = vpop.permute.xlu1 %1185 }
 0x8c3   : > { %v1086_v13 = vpop.f32.mrf.mxu0 }
 0x8c4   : > { %v1087_v14 = vadd.f32 %v1086_v13, %v1012_v12  ;;  %v1589_v12 = vld [vmem:[%s2754_s11 + $0x10] sm:$0xff]  ;;  %v1588_v13 = vld [vmem:[%s2754_s11 + $0x8] sm:$0xff] }
 0x8c5   : > { %v1949_v15 = vpop.f32.mrf.mxu0 }
 0x8c6   : > { %v1090_v16 = vmax.f32 %v1087_v14, 0.0  ;;  %v1587_v14 = vld [vmem:[%s2754_s11] sm:$0xff] }
 0x8c8   : > { %1091 = vrot.lane.b32.xlu0 %v1090_v16, %s2768_s0  ;;  %1951 = vmatpush3.msra.mxu1 %v1090_v16 }
 0x8c9   : > { %1952 = vmatprep.subr.mxu1 %v2190_v0 }
 0x8cc   : > { %1100 = vperm.xlu0 %2125, %v1791_v17  }
 0x8d0   : > { %1575 = vperm.xlu0 %2125, %v1572_v18  }
 0x93a   : > { %v1092_v19 = vpop.permute.xlu0 %1091 }
 0x93b   : > { %1953 = vmatpush3.msk.msra.mxu1 %vm821_vm6, %v1092_v19 }
 0x93c   : > { %1955 = vmatmul.mubr.msk.f32.vlgmr.msra.gmra.mxu1 %vm1017_vm7, %v1105_v20  ;;  %1962 = vmatprep.subr.mxu1 %v2190_v0  ;;  %v1583_v20 = vpop.permute.xlu1 %1582 }
 0x93d   : > { %1994 = vmatprep.mubr.msk.f32.mxu1 %vm2191_vm0, %v2190_v0  ;;  %1963 = vmatpush3.msra.mxu1 %v2484_v21 }
 0x93e   : > { %1964 = vmatprep.subr.mxu1 %v2190_v0 }
 0x93f   : > { %1965 = vmatpush3.msra.mxu1 %v2489_v22 }
 0x940   : > { %1966 = vmatprep.subr.mxu1 %v2190_v0 }
 0x941   : > { %1967 = vmatpush3.msra.mxu1 %v2496_v7 }
 0x942   : > { %1968 = vmatprep.subr.mxu1 %v2190_v0 }
 0x943   : > { %1969 = vmatpush3.msra.mxu1 %v2503_v23 }
 0x944   : > { %1970 = vmatprep.subr.mxu1 %v2190_v0 }
 0x945   : > { %1971 = vmatpush3.msra.mxu1 %v2510_v24 }
 0x946   : > { %1972 = vmatprep.subr.mxu1 %v2190_v0 }
 0x947   : > { %1973 = vmatpush3.msra.mxu1 %v2517_v25  ;;  %v1101_v34 = vpop.permute.xlu0 %1100 }
 0x948   : > { %1974 = vmatprep.subr.mxu1 %v2190_v0 }
 0x949   : > { %1975 = vmatpush3.msra.mxu1 %v2524_v26 }
 0x94a   : > { %1976 = vmatprep.subr.mxu1 %v2190_v0 }
 0x94b   : > { %1977 = vmatpush3.msra.mxu1 %v2531_v27  ;;  %v1576_v17 = vpop.permute.xlu0 %1575 }
 0x94c   : > { %1978 = vmatprep.subr.mxu1 %v2190_v0 }
 0x94d   : > { %1979 = vmatpush3.msra.mxu1 %v2538_v28 }
 0x94e   : > { %1980 = vmatprep.subr.mxu1 %v2190_v0 }
 0x94f   : > { %1981 = vmatpush3.msra.mxu1 %v2545_v29 }
 0x950   : > { %1982 = vmatprep.subr.mxu1 %v2190_v0 }
 0x951   : > { %1983 = vmatpush3.msra.mxu1 %v2552_v30 }
 0x952   : > { %1984 = vmatprep.subr.mxu1 %v2190_v0 }
 0x953   : > { %1985 = vmatpush3.msra.mxu1 %v2559_v31 }
 0x954   : > { %1986 = vmatprep.subr.mxu1 %v2190_v0 }
 0x955   : > { %1987 = vmatpush3.msra.mxu1 %v2566_v32 }
 0x956   : > { %1988 = vmatprep.subr.mxu1 %v2190_v0 }
 0x957   : > { %1989 = vmatpush3.msra.mxu1 %v2573_v33 }
 0x958   : > { %1990 = vmatprep.subr.mxu1 %v2190_v0 }
 0x959   : > { %1991 = vmatpush3.msra.mxu1 %v1263_v42 }
 0x95a   : > { %1992 = vmatprep.subr.mxu1 %v2190_v0 }
 0x95b   : > { %1993 = vmatpush3.msra.mxu1 %v1262_v43 }
 0x95c   : > { %2037 = vmatprep.subr.mxu1 %v2190_v0 }
 0x9fc   : > { %v1174_v35 = vpop.f32.mrf.mxu1 }
 0x9fd   : > { %v1175_v36 = vadd.f32 %v1174_v35, %v1101_v34 }
 0x9fe   : > { %v1956_v37 = vpop.f32.mrf.mxu1 }
 0x9ff   : > { %v1178_v38 = vmax.f32 %v1175_v36, 0.0 }
 0xa01   : > { %v1179_v39 = vadd.f32 %v1178_v38, %v2443_v4  ;;  %v1596_v4 = vld [vmem:[%s2754_s11 + $0x48] sm:$0xff] }
 0xa03   : > { %v1180_v40 = vmax.f32 %v1179_v39, 0.0 }
 0xa05   : > { %1958 = vmatpush3.msra.mxu0 %v1180_v40 }
 0xa06   : > { %1960 = vmatmul.mubr.msk.f32.vlgmr.msra.gmra.mxu0 %vm1188_vm8, %v1181_v41  ;;  %1997 = vmatprep.subr.mxu0 %v2190_v0 }
 0xa07   : > { %1999 = vmatprep.mubr.msk.f32.mxu0 %vm2191_vm0, %v2190_v0  ;;  %1998 = vmatpush3.msra.mxu0 %v1278_v48 }
 0xa08   : > { %2002 = vmatprep.subr.mxu0 %v2190_v0 }
 0xac6   : > { %v1258_v45 = vpop.f32.mrf.mxu0 }
 0xac7   : > { %v1259_v46 = vadd.f32 %v1258_v45, %v1186_v44 }
 0xac8   : > { %v1961_v47 = vpop.f32.mrf.mxu0 }
 0xac9   : > { %1995 = vmatmul.mubr.f32.vlgmr.msra.gmra.mxu1 %v1259_v46 }
 0xaca   : > { %2039 = vmatprep.mubr.msk.f32.mxu1 %vm2191_vm0, %v2190_v0  ;;  %2038 = vmatpush3.msra.mxu1 %v1278_v48 }
 0xacb   : > { %2042 = vmatprep.subr.mxu1 %v2190_v0 }
 0xb89   : > { %v1345_v49 = vpop.f32.mrf.mxu1 }
 0xb8a   : > { %v1349_v50 = vmul.f32 0.0625, %v1345_v49 }
 0xb8b   : > { %v1996_v51 = vpop.f32.mrf.mxu1 }
 0xb8c   : > { %2000 = vmatmul.mubr.msk.f32.vlgmr.msra.gmra.mxu0 %vm1188_vm8, %v1349_v50 }
 0xb8d   : > { %2003 = vmatpush3.msra.mxu0 %v2484_v21  ;;  %2034 = vmatprep.mubr.msk.f32.mxu0 %vm2191_vm0, %v2190_v0 }
 0xb8e   : > { %2004 = vmatprep.subr.mxu0 %v2190_v0 }
 0xb8f   : > { %2005 = vmatpush3.msra.mxu0 %v2489_v22 }
 0xb90   : > { %2006 = vmatprep.subr.mxu0 %v2190_v0 }
 0xb91   : > { %2007 = vmatpush3.msra.mxu0 %v2496_v7  ;;  %v1797_v7 = vld [vmem:[%s2755_s12] ss:$0 sm:$0xff] }
 0xb92   : > { %2008 = vmatprep.subr.mxu0 %v2190_v0 }
 0xb93   : > { %2009 = vmatpush3.msra.mxu0 %v2503_v23 }
 0xb94   : > { %2010 = vmatprep.subr.mxu0 %v2190_v0 }
 0xb95   : > { %2011 = vmatpush3.msra.mxu0 %v2510_v24 }
 0xb96   : > { %2012 = vmatprep.subr.mxu0 %v2190_v0 }
 0xb97   : > { %2013 = vmatpush3.msra.mxu0 %v2517_v25 }
 0xb98   : > { %2014 = vmatprep.subr.mxu0 %v2190_v0 }
 0xb99   : > { %2015 = vmatpush3.msra.mxu0 %v2524_v26 }
 0xb9a   : > { %2016 = vmatprep.subr.mxu0 %v2190_v0 }
 0xb9b   : > { %2017 = vmatpush3.msra.mxu0 %v2531_v27 }
 0xb9c   : > { %2018 = vmatprep.subr.mxu0 %v2190_v0 }
 0xb9d   : > { %2019 = vmatpush3.msra.mxu0 %v2538_v28 }
 0xb9e   : > { %2020 = vmatprep.subr.mxu0 %v2190_v0 }
 0xb9f   : > { %2021 = vmatpush3.msra.mxu0 %v2545_v29 }
 0xba0   : > { %2022 = vmatprep.subr.mxu0 %v2190_v0 }
 0xba1   : > { %2023 = vmatpush3.msra.mxu0 %v2552_v30 }
 0xba2   : > { %2024 = vmatprep.subr.mxu0 %v2190_v0 }
 0xba3   : > { %2025 = vmatpush3.msra.mxu0 %v2559_v31 }
 0xba4   : > { %2026 = vmatprep.subr.mxu0 %v2190_v0 }
 0xba5   : > { %2027 = vmatpush3.msra.mxu0 %v2566_v32 }
 0xba6   : > { %2028 = vmatprep.subr.mxu0 %v2190_v0 }
 0xba7   : > { %2029 = vmatpush3.msra.mxu0 %v2573_v33 }
 0xba8   : > { %2030 = vmatprep.subr.mxu0 %v2190_v0 }
 0xba9   : > { %2031 = vmatpush3.msra.mxu0 %v1263_v42 }
 0xbaa   : > { %2032 = vmatprep.subr.mxu0 %v2190_v0 }
 0xbab   : > { %2033 = vmatpush3.msra.mxu0 %v1262_v43 }
 0xc4c   : > { %v1419_v52 = vpop.f32.mrf.mxu0 }
 0xc4d   : > { %v1423_v53 = vsub.f32 %v1259_v46, %v1419_v52 }
 0xc4e   : > { %v2001_v54 = vpop.f32.mrf.mxu0 }
 0xc4f   : > { %v1424_v55 = vmul.f32 %v1423_v53, %v1423_v53 }
 0xc51   : > { %2035 = vmatmul.mubr.f32.vlgmr.msra.gmra.mxu0 %v1424_v55 }
 0xd11   : > { %v1491_v56 = vpop.f32.mrf.mxu0 }
 0xd12   : > { %v1495_v57 = vmul.f32 0.0625, %v1491_v56 }
 0xd13   : > { %v2036_v58 = vpop.f32.mrf.mxu0 }
 0xd14   : > { %v1496_v59 = vadd.f32 1e-05, %v1495_v57 }
 0xd16   : > { %2126 = vrsqrt.f32 %v1496_v59 }
 0xd23   : > { %v2127_v61 = vpop.eup %2126 }
 0xd24   : > { %2040 = vmatmul.mubr.msk.f32.vlgmr.msra.gmra.mxu1 %vm1188_vm8, %v2127_v61 }
 0xd25   : > { %2043 = vmatpush3.msra.mxu1 %v1602_v60  ;;  %2074 = vmatprep.mubr.msk.f32.mxu1 %vm2191_vm0, %v2190_v0 }
 0xd26   : > { %2044 = vmatprep.subr.mxu1 %v2190_v0 }
 0xd27   : > { %2045 = vmatpush3.msra.mxu1 %v1601_v62 }
 0xd28   : > { %2046 = vmatprep.subr.mxu1 %v2190_v0 }
 0xd29   : > { %2047 = vmatpush3.msra.mxu1 %v1600_v63 }
 0xd2a   : > { %2048 = vmatprep.subr.mxu1 %v2190_v0 }
 0xd2b   : > { %2049 = vmatpush3.msra.mxu1 %v1599_v1 }
 0xd2c   : > { %2050 = vmatprep.subr.mxu1 %v2190_v0 }
 0xd2d   : > { %2051 = vmatpush3.msra.mxu1 %v1598_v2 }
 0xd2e   : > { %2052 = vmatprep.subr.mxu1 %v2190_v0 }
 0xd2f   : > { %2053 = vmatpush3.msra.mxu1 %v1597_v3 }
 0xd30   : > { %2054 = vmatprep.subr.mxu1 %v2190_v0 }
 0xd31   : > { %2055 = vmatpush3.msra.mxu1 %v1596_v4 }
 0xd32   : > { %2056 = vmatprep.subr.mxu1 %v2190_v0 }
 0xd33   : > { %2057 = vmatpush3.msra.mxu1 %v1595_v5 }
 0xd34   : > { %2058 = vmatprep.subr.mxu1 %v2190_v0 }
 0xd35   : > { %2059 = vmatpush3.msra.mxu1 %v1594_v6 }
 0xd36   : > { %2060 = vmatprep.subr.mxu1 %v2190_v0 }
 0xd37   : > { %2061 = vmatpush3.msra.mxu1 %v1593_v8 }
 0xd38   : > { %2062 = vmatprep.subr.mxu1 %v2190_v0 }
 0xd39   : > { %2063 = vmatpush3.msra.mxu1 %v1592_v9 }
 0xd3a   : > { %2064 = vmatprep.subr.mxu1 %v2190_v0 }
 0xd3b   : > { %2065 = vmatpush3.msra.mxu1 %v1591_v10 }
 0xd3c   : > { %2066 = vmatprep.subr.mxu1 %v2190_v0 }
 0xd3d   : > { %2067 = vmatpush3.msra.mxu1 %v1590_v11 }
 0xd3e   : > { %2068 = vmatprep.subr.mxu1 %v2190_v0 }
 0xd3f   : > { %2069 = vmatpush3.msra.mxu1 %v1589_v12 }
 0xd40   : > { %2070 = vmatprep.subr.mxu1 %v2190_v0 }
 0xd41   : > { %2071 = vmatpush3.msra.mxu1 %v1588_v13 }
 0xd42   : > { %2072 = vmatprep.subr.mxu1 %v2190_v0 }
 0xd43   : > { %2073 = vmatpush3.msra.mxu1 %v1587_v14 }
 0xde4   : > { %v1567_v15 = vpop.f32.mrf.mxu1 }
 0xde5   : > { %v1571_v16 = vmul.f32 %v1567_v15, %v1423_v53 }
 0xde6   : > { %v2041_v18 = vpop.f32.mrf.mxu1 }
 0xde7   : > { %v1578_v19 = vmul.f32 %v1576_v17, %v1571_v16 }
 0xde9   : > { %v1585_v21 = vadd.f32 %v1583_v20, %v1578_v19 }
 0xdeb   : > { %v1586_v22 = vmax.f32 %v1585_v21, 0.0 }
 0xded   : > { %2075 = vmatmul.mubr.f32.vlgmr.msra.gmra.mxu1 %v1586_v22 }
 0xead   : > { %v1676_v0 = vpop.f32.mrf.mxu1 }
 0xeae   : > { %v1677_v23 = vadd.f32 %v1797_v7, %v1676_v0 }
 0xeaf   : > { %v2076_v24 = vpop.f32.mrf.mxu1 }
 0xeb0   : > { %1680 = vst [vmem:[%s431_s24] sm:$0xff] %v1677_v23 }
 0xeb1   : > { %2141 = shalt.err (!%p2138_p3)
}
 0xeb2   : > { %s2142_s22 = scalar_lea.hbm %s2708_s1, 128  ;;  %s2146_s24 = scalar_lea.hbm %s2756_s13, 256 }
 0xeb3   : > { %p2143_p4 = scmp.ne.s32.totalorder %s2708_s1, %s2142_s22  ;;  %p2147_p9 = scmp.lt.s32.totalorder %s2708_s1, %s2756_s13 }
 0xeb4   : > { %p2148_p10 = scmp.lt.s32.totalorder %s2146_s24, %s2142_s22 }
 0xeb5   : > { %p2144_p7 = pnand %p2143_p4, %p2307_p5 }
 0xeb6   : > { %p2149_p11 = por %p2148_p10, %p2147_p9 }
 0xeb7   : > { %p2145_p8 = pneg %p2144_p7 }
 0xeb9   : > { %p2150_p12 = pnand %p2149_p11, %p2145_p8 }
 0xebb   : > { %2153 = shalt.err (!%p2150_p12)
}
 0xebc   : > { %2077 = dma.vmem_to_hbm [thread:$0]  (%p2307_p5), %s1696_s16, 128, %s2708_s1, %s1682_s2  }
 0xebd PF: > { %p2083_p13 = scmp.ge.s32.totalorder %s2188_s28, 2  ;;  %s1707_s3 = sand.u32 1, %s2176_s25  }
 0xebe   : > { %s1708_s21 = scalar_lea.sflag [#allocation3], %s1707_s3 }
 0xebf   : > { %p2080_p0 = pnand %p2083_p13, %p2311_p6 }
 0xec1   : > { %p2081_p1 = pneg %p2080_p0 }
 0xec3   : > { %2171 = dma.done.wait (%p2081_p1), %s1708_s21, 128  }
 0xec4   : > { %2173 = vsyncadd (%p2081_p1), %s1708_s21, 4294967168  ;;  %p23_p2 = scmp.ge.s32.totalorder %s2294_s14, 4   ;;  %s2769_s25 = smov %s2180_s26 }
 0xec5   : > { %s2770_s26 = smov %s2184_s27  ;;  %s2771_s27 = smov %s2305_s17 }
 0xec6   : > { %s2772_s28 = smov %s2294_s14  ;;  %25 = sbr.rel (!%p23_p2) target bundleno = 8 (0x8), region = 119 }
 0xecb   :  { %1713 = vsyncpa [#allocation3], 1 }
 0xecc   :  { %1715 = vsyncpa [#allocation3 + $0x1], 1 }

</bundles_post_ra>
